<compile_context>
chip_gen: v5e
topology: v5e:2x2
jax: 0.10.0
libtpu: 0.0.40
codegen_flags: <defaults>
</compile_context>

<pallas_src>
import functools

import jax
import jax.numpy as jnp
from jax.experimental import pallas as pl
from jax.experimental.pallas import tpu as pltpu

BLOCK_SIZE = 32                 # matches `block_size` (max positions) in the PyTorch file
MATMUL_DTYPE = jnp.bfloat16     # MXU input dtype; set to jnp.float32 for exact-f32 matmuls
NEG_BIAS = -1e9                 # additive mask value for blocked positions (finite, no NaN)


# ------------------------------------------------------------------
# Pallas kernel: one encoder layer step for one batch row-group.
# Grid = (row_groups, num_layers); activations live in out_ref across layers.
# ------------------------------------------------------------------
def encoder_stack_kernel(
    x_ref, bias_ref,
    wq_ref, bq_ref, wk_ref, bk_ref, wv_ref, bv_ref, wo_ref, bo_ref,
    g1_ref, be1_ref, w1_ref, bf1_ref, w2_ref, bf2_ref, g2_ref, be2_ref,
    out_ref, attn_ref,
):
    layer = pl.program_id(1)

    GB, S, E = out_ref.shape          # (group batch, seq, emb)
    H = attn_ref.shape[1]             # attn block is (GB, H, S, S)
    D = E // H
    M = GB * S
    scale = float(D) ** -0.5

    # Layer 0 seeds the resident activation block from HBM input; afterwards the
    # previous layer's output (already in this VMEM block) is reused directly.
    @pl.when(layer == 0)
    def _():
        out_ref[...] = x_ref[...]

    x = out_ref[...].reshape(M, E)                       # (M, E) f32, batch folded into rows
    xc = x.astype(MATMUL_DTYPE)

    # --- QKV projections on the folded (M, E) block (MXU, f32 accumulate) ---
    q = jnp.dot(xc, wq_ref[...], preferred_element_type=jnp.float32) + bq_ref[...]
    k = jnp.dot(xc, wk_ref[...], preferred_element_type=jnp.float32) + bk_ref[...]
    v = jnp.dot(xc, wv_ref[...], preferred_element_type=jnp.float32) + bv_ref[...]
    q = q * scale                                        # fold 1/sqrt(D) into q once

    q4 = q.reshape(GB, S, H, D).astype(MATMUL_DTYPE)
    k4 = k.reshape(GB, S, H, D).astype(MATMUL_DTYPE)
    v4 = v.reshape(GB, S, H, D).astype(MATMUL_DTYPE)

    bias = bias_ref[...]                                 # (S, S) additive window mask, f32

    # --- head-batched windowed attention (static loop over the small group batch) ---
    ctx_rows = []
    for b in range(GB):
        s = jnp.einsum("qhd,khd->hqk", q4[b], k4[b],
                       preferred_element_type=jnp.float32)          # (H, S, S)
        s = s + bias[None, :, :]
        s = s - jnp.max(s, axis=-1, keepdims=True)
        p = jnp.exp(s)
        denom = jnp.sum(p, axis=-1, keepdims=True)
        p = p * pl.reciprocal(denom, approx=True)                   # softmax over keys
        attn_ref[b] = p                                             # one whole-block store

        ctx = jnp.einsum("hqk,khd->qhd", p.astype(MATMUL_DTYPE), v4[b],
                         preferred_element_type=jnp.float32)        # (S, H, D)
        ctx_rows.append(ctx.reshape(S, E))
    ctx = ctx_rows[0] if GB == 1 else jnp.concatenate(ctx_rows, axis=0)   # (M, E)

    attn_out = jnp.dot(ctx.astype(MATMUL_DTYPE), wo_ref[...],
                       preferred_element_type=jnp.float32) + bo_ref[...]

    # --- residual + LayerNorm 1 (eps = 1e-5, PyTorch default) ---
    h1 = x + attn_out
    mu1 = jnp.mean(h1, axis=-1, keepdims=True)
    var1 = jnp.mean((h1 - mu1) ** 2, axis=-1, keepdims=True)
    h1n = (h1 - mu1) * jax.lax.rsqrt(var1 + 1e-5) * g1_ref[...] + be1_ref[...]

    # --- feed-forward: Linear(E, 2E) -> ReLU -> Linear(2E, E) ---
    f = jnp.dot(h1n.astype(MATMUL_DTYPE), w1_ref[...],
                preferred_element_type=jnp.float32) + bf1_ref[...]
    f = jnp.maximum(f, 0.0)
    f = jnp.dot(f.astype(MATMUL_DTYPE), w2_ref[...],
                preferred_element_type=jnp.float32) + bf2_ref[...]

    # --- residual + LayerNorm 2 ---
    h2 = h1n + f
    mu2 = jnp.mean(h2, axis=-1, keepdims=True)
    var2 = jnp.mean((h2 - mu2) ** 2, axis=-1, keepdims=True)
    y = (h2 - mu2) * jax.lax.rsqrt(var2 + 1e-5) * g2_ref[...] + be2_ref[...]

    out_ref[...] = y.reshape(GB, S, E)                   # stays resident for the next layer


# ------------------------------------------------------------------
# Wrapper: one pallas_call for the whole layer stack.
# ------------------------------------------------------------------
def encoder_stack(x, bias, stacked_params, num_heads):
    B, S, E = x.shape
    H = num_heads
    (wq, bq, wk, bk, wv, bv, wo, bo,
     g1, be1, w1, bf1, w2, bf2, g2, be2) = stacked_params
    L = wq.shape[0]
    F = w1.shape[-1]

    # bf16 matmul operands (f32 accumulation inside the kernel); also halves weight DMA.
    wq, wk, wv, wo, w1, w2 = (w.astype(MATMUL_DTYPE) for w in (wq, wk, wv, wo, w1, w2))

    # One row-group per TensorCore (v7x megacore); remaining batch folded into M.
    G = 2 if (B % 2 == 0 and B >= 2) else 1
    GB = B // G

    def wspec(*shape):
        # Per-layer weight block: squeeze the stacked layer dim, index by layer step.
        return pl.BlockSpec((None,) + shape, lambda g, l: (l,) + (0,) * len(shape))

    in_specs = [
        pl.BlockSpec((GB, S, E), lambda g, l: (g, 0, 0)),   # x (only read at layer 0)
        pl.BlockSpec((S, S), lambda g, l: (0, 0)),          # additive window-mask bias
        wspec(E, E), wspec(1, E),                           # wq, bq
        wspec(E, E), wspec(1, E),                           # wk, bk
        wspec(E, E), wspec(1, E),                           # wv, bv
        wspec(E, E), wspec(1, E),                           # wo, bo
        wspec(1, E), wspec(1, E),                           # ln1 gamma, beta
        wspec(E, F), wspec(1, F),                           # ffn w1, b1
        wspec(F, E), wspec(1, E),                           # ffn w2, b2
        wspec(1, E), wspec(1, E),                           # ln2 gamma, beta
    ]
    out_specs = (
        # Constant block index across the layer axis => activations resident in VMEM.
        pl.BlockSpec((GB, S, E), lambda g, l: (g, 0, 0)),
        pl.BlockSpec((None, GB, H, S, S), lambda g, l: (l, g, 0, 0, 0)),
    )

    out, attn = pl.pallas_call(
        encoder_stack_kernel,
        grid_spec=pltpu.PrefetchScalarGridSpec(
            num_scalar_prefetch=0,
            grid=(G, L),
            in_specs=in_specs,
            out_specs=out_specs,
        ),
        out_shape=(
            jax.ShapeDtypeStruct((B, S, E), jnp.float32),
            jax.ShapeDtypeStruct((L, B, H, S, S), jnp.float32),
        ),
        compiler_params=pltpu.CompilerParams(
            dimension_semantics=("parallel", "arbitrary")),
    )(x, bias,
      wq, bq, wk, bk, wv, bv, wo, bo,
      g1, be1, w1, bf1, w2, bf2, g2, be2)
    return out, attn


# ------------------------------------------------------------------
# Parameter construction (deterministic, synthetic). Layer params are stacked
# along a leading num_layers axis so the kernel can stream them per layer step.
# ------------------------------------------------------------------
def init_params(key, vocab_size, embedding_dim, num_heads, num_layers):
    E = embedding_dim
    F = 2 * E
    keys = jax.random.split(key, 2 + num_layers)

    word_emb = 0.02 * jax.random.normal(keys[0], (vocab_size, E), jnp.float32)
    pos_emb = 0.02 * jax.random.normal(keys[1], (BLOCK_SIZE, E), jnp.float32)

    zeroE = jnp.zeros((1, E), jnp.float32)
    zeroF = jnp.zeros((1, F), jnp.float32)
    onesE = jnp.ones((1, E), jnp.float32)

    per_layer = []
    for l in range(num_layers):
        lk = jax.random.split(keys[2 + l], 6)
        # Linear weights stored as (in, out): PyTorch W (out, in) pre-transposed.
        wq = 0.02 * jax.random.normal(lk[0], (E, E), jnp.float32)
        wk = 0.02 * jax.random.normal(lk[1], (E, E), jnp.float32)
        wv = 0.02 * jax.random.normal(lk[2], (E, E), jnp.float32)
        wo = 0.02 * jax.random.normal(lk[3], (E, E), jnp.float32)
        w1 = 0.02 * jax.random.normal(lk[4], (E, F), jnp.float32)
        w2 = 0.02 * jax.random.normal(lk[5], (F, E), jnp.float32)
        per_layer.append((
            wq, zeroE, wk, zeroE, wv, zeroE, wo, zeroE,
            onesE, zeroE,            # LN1 gamma / beta
            w1, zeroF, w2, zeroE,    # FFN
            onesE, zeroE,            # LN2 gamma / beta
        ))
    stacked = tuple(jnp.stack(ps, axis=0) for ps in zip(*per_layer))
    return word_emb, pos_emb, stacked


def make_window_bias(seq_len, attention_window):
    # Additive mask: 0 where |i-j| <= window (attend), large negative otherwise.
    i = jnp.arange(seq_len)[:, None]
    j = jnp.arange(seq_len)[None, :]
    attend = jnp.abs(i - j) <= attention_window
    return jnp.where(attend, 0.0, NEG_BIAS).astype(jnp.float32)


# ------------------------------------------------------------------
# Full model forward (embedding glue + fused per-stack Pallas kernel).
# ------------------------------------------------------------------
@functools.partial(jax.jit, static_argnames=("num_heads", "attention_window"))
def transformer_encoder2(tokens, word_emb, pos_emb, stacked_layer_params,
                         num_heads, attention_window):
    B, S = tokens.shape
    assert S <= BLOCK_SIZE and S <= pos_emb.shape[0], \
        "sequence length exceeds position-embedding table (block_size)"
    # PositionalEncoding: word_embedding(x) + position_embedding(arange(S))
    # TODO(synk): embedding gathers stay in plain JAX (XLA gather); no Pallas kernel needed here.
    x = jnp.take(word_emb, tokens, axis=0) + pos_emb[:S][None, :, :]
    bias = make_window_bias(S, attention_window)

    out, attn = encoder_stack(x, bias, stacked_layer_params, num_heads)
    attn_maps = [attn[l] for l in range(attn.shape[0])]
    return out, attn_maps


if __name__ == "__main__":
    # Small deterministic configuration.
    vocab_size = 50
    embedding_dim = 32
    num_heads = 4
    num_layers = 2
    attention_window = 2
    B, S = 2, 8

    key = jax.random.PRNGKey(0)
    pkey, tkey = jax.random.split(key)
    word_emb, pos_emb, stacked = init_params(
        pkey, vocab_size, embedding_dim, num_heads, num_layers)
    tokens = jax.random.randint(tkey, (B, S), 0, vocab_size, dtype=jnp.int32)

    out, attn_maps = transformer_encoder2(
        tokens, word_emb, pos_emb, stacked, num_heads, attention_window)

    jax.block_until_ready(out)
    for a in attn_maps:
        jax.block_until_ready(a)

    assert out.shape == (B, S, embedding_dim)
    assert len(attn_maps) == num_layers
    assert attn_maps[0].shape == (B, num_heads, S, S)
    assert bool(jnp.all(jnp.isfinite(out)))
    # Softmax rows should sum to ~1 (approx-reciprocal tolerance).
    row_sums = jnp.sum(attn_maps[0], axis=-1)
    assert float(jnp.max(jnp.abs(row_sums - 1.0))) < 5e-2
    print("KERNEL_OK")
</pallas_src>

<mosaic_0001>
module attributes {stable_mosaic.version = 11 : i64} {
  func.func @encoder_stack_kernel(%arg0: i32, %arg1: i32, %arg2: memref<1x8x32xf32, #tpu.memory_space<vmem>>, %arg3: memref<8x8xf32, #tpu.memory_space<vmem>>, %arg4: memref<1x32x32xbf16, #tpu.memory_space<vmem>>, %arg5: memref<1x1x32xf32, #tpu.memory_space<vmem>>, %arg6: memref<1x32x32xbf16, #tpu.memory_space<vmem>>, %arg7: memref<1x1x32xf32, #tpu.memory_space<vmem>>, %arg8: memref<1x32x32xbf16, #tpu.memory_space<vmem>>, %arg9: memref<1x1x32xf32, #tpu.memory_space<vmem>>, %arg10: memref<1x32x32xbf16, #tpu.memory_space<vmem>>, %arg11: memref<1x1x32xf32, #tpu.memory_space<vmem>>, %arg12: memref<1x1x32xf32, #tpu.memory_space<vmem>>, %arg13: memref<1x1x32xf32, #tpu.memory_space<vmem>>, %arg14: memref<1x32x64xbf16, #tpu.memory_space<vmem>>, %arg15: memref<1x1x64xf32, #tpu.memory_space<vmem>>, %arg16: memref<1x64x32xbf16, #tpu.memory_space<vmem>>, %arg17: memref<1x1x32xf32, #tpu.memory_space<vmem>>, %arg18: memref<1x1x32xf32, #tpu.memory_space<vmem>>, %arg19: memref<1x1x32xf32, #tpu.memory_space<vmem>>, %arg20: memref<1x8x32xf32, #tpu.memory_space<vmem>>, %arg21: memref<1x1x4x8x8xf32, #tpu.memory_space<vmem>>) attributes {dimension_semantics = [#tpu.dimension_semantics<parallel>, #tpu.dimension_semantics<arbitrary>], iteration_bounds = array<i64: 2, 2>, scalar_prefetch = 0 : i64, scratch_operands = 0 : i64, tpu.core_type = #tpu.core_type<tc>, window_params = [{transform_indices = @transform_0, window_bounds = array<i64: 1, 8, 32>}, {pipeline_mode = #tpu.pipeline_mode<synchronous>, transform_indices = @transform_1, window_bounds = array<i64: 8, 8>}, {transform_indices = @transform_2, window_bounds = array<i64: 1, 32, 32>}, {transform_indices = @transform_3, window_bounds = array<i64: 1, 1, 32>}, {transform_indices = @transform_4, window_bounds = array<i64: 1, 32, 32>}, {transform_indices = @transform_5, window_bounds = array<i64: 1, 1, 32>}, {transform_indices = @transform_6, window_bounds = array<i64: 1, 32, 32>}, {transform_indices = @transform_7, window_bounds = array<i64: 1, 1, 32>}, {transform_indices = @transform_8, window_bounds = array<i64: 1, 32, 32>}, {transform_indices = @transform_9, window_bounds = array<i64: 1, 1, 32>}, {transform_indices = @transform_10, window_bounds = array<i64: 1, 1, 32>}, {transform_indices = @transform_11, window_bounds = array<i64: 1, 1, 32>}, {transform_indices = @transform_12, window_bounds = array<i64: 1, 32, 64>}, {transform_indices = @transform_13, window_bounds = array<i64: 1, 1, 64>}, {transform_indices = @transform_14, window_bounds = array<i64: 1, 64, 32>}, {transform_indices = @transform_15, window_bounds = array<i64: 1, 1, 32>}, {transform_indices = @transform_16, window_bounds = array<i64: 1, 1, 32>}, {transform_indices = @transform_17, window_bounds = array<i64: 1, 1, 32>}, {transform_indices = @transform_18, window_bounds = array<i64: 1, 8, 32>}, {transform_indices = @transform_19, window_bounds = array<i64: 1, 1, 4, 8, 8>}]} {
    %c0_i32 = arith.constant 0 : i32
    %0 = arith.cmpi eq, %arg1, %c0_i32 : i32
    %1 = arith.extui %0 : i1 to i32
    %c0_i32_0 = arith.constant 0 : i32
    %2 = arith.cmpi ne, %1, %c0_i32_0 : i32
    scf.if %2 {
      %c0_82 = arith.constant 0 : index
      %c0_83 = arith.constant 0 : index
      %c0_84 = arith.constant 0 : index
      %142 = vector.load %arg2[%c0_82, %c0_83, %c0_84] : memref<1x8x32xf32, #tpu.memory_space<vmem>>, vector<1x8x32xf32>
      %c0_85 = arith.constant 0 : index
      %c0_86 = arith.constant 0 : index
      %c0_87 = arith.constant 0 : index
      %143 = vector.load %arg20[%c0_85, %c0_86, %c0_87] : memref<1x8x32xf32, #tpu.memory_space<vmem>>, vector<1x8x32xf32>
      tpu.vector_store %arg20[%c0_85, %c0_86, %c0_87], %142 {strides = array<i32>} : memref<1x8x32xf32, #tpu.memory_space<vmem>>, vector<1x8x32xf32>,
    } else {
    }
    %c0 = arith.constant 0 : index
    %c0_1 = arith.constant 0 : index
    %c0_2 = arith.constant 0 : index
    %3 = vector.load %arg20[%c0, %c0_1, %c0_2] : memref<1x8x32xf32, #tpu.memory_space<vmem>>, vector<1x8x32xf32>
    %4 = vector.shape_cast %3 : vector<1x8x32xf32> to vector<8x32xf32>
    %5 = arith.truncf %4 : vector<8x32xf32> to vector<8x32xbf16>
    %c0_3 = arith.constant 0 : index
    %c0_4 = arith.constant 0 : index
    %c0_5 = arith.constant 0 : index
    %6 = vector.load %arg4[%c0_3, %c0_4, %c0_5] : memref<1x32x32xbf16, #tpu.memory_space<vmem>>, vector<1x32x32xbf16>
    %7 = vector.shape_cast %6 : vector<1x32x32xbf16> to vector<32x32xbf16>
    %cst = arith.constant dense<0.000000e+00> : vector<8x32xf32>
    %8 = tpu.matmul %5, %7, %cst {dimension_numbers = #tpu.dot_dimension_numbers<[1], [0], [0], [1], [0, 0, 1, 1], [], []>} : vector<8x32xbf16>, vector<32x32xbf16>, vector<8x32xf32> -> vector<8x32xf32>
    %c0_6 = arith.constant 0 : index
    %c0_7 = arith.constant 0 : index
    %c0_8 = arith.constant 0 : index
    %9 = vector.load %arg5[%c0_6, %c0_7, %c0_8] : memref<1x1x32xf32, #tpu.memory_space<vmem>>, vector<1x1x32xf32>
    %10 = vector.shape_cast %9 : vector<1x1x32xf32> to vector<1x32xf32>
    %11 = vector.broadcast %10 : vector<1x32xf32> to vector<8x32xf32>
    %12 = arith.addf %8, %11 : vector<8x32xf32>
    %c0_9 = arith.constant 0 : index
    %c0_10 = arith.constant 0 : index
    %c0_11 = arith.constant 0 : index
    %13 = vector.load %arg6[%c0_9, %c0_10, %c0_11] : memref<1x32x32xbf16, #tpu.memory_space<vmem>>, vector<1x32x32xbf16>
    %14 = vector.shape_cast %13 : vector<1x32x32xbf16> to vector<32x32xbf16>
    %cst_12 = arith.constant dense<0.000000e+00> : vector<8x32xf32>
    %15 = tpu.matmul %5, %14, %cst_12 {dimension_numbers = #tpu.dot_dimension_numbers<[1], [0], [0], [1], [0, 0, 1, 1], [], []>} : vector<8x32xbf16>, vector<32x32xbf16>, vector<8x32xf32> -> vector<8x32xf32>
    %c0_13 = arith.constant 0 : index
    %c0_14 = arith.constant 0 : index
    %c0_15 = arith.constant 0 : index
    %16 = vector.load %arg7[%c0_13, %c0_14, %c0_15] : memref<1x1x32xf32, #tpu.memory_space<vmem>>, vector<1x1x32xf32>
    %17 = vector.shape_cast %16 : vector<1x1x32xf32> to vector<1x32xf32>
    %18 = vector.broadcast %17 : vector<1x32xf32> to vector<8x32xf32>
    %19 = arith.addf %15, %18 : vector<8x32xf32>
    %c0_16 = arith.constant 0 : index
    %c0_17 = arith.constant 0 : index
    %c0_18 = arith.constant 0 : index
    %20 = vector.load %arg8[%c0_16, %c0_17, %c0_18] : memref<1x32x32xbf16, #tpu.memory_space<vmem>>, vector<1x32x32xbf16>
    %21 = vector.shape_cast %20 : vector<1x32x32xbf16> to vector<32x32xbf16>
    %cst_19 = arith.constant dense<0.000000e+00> : vector<8x32xf32>
    %22 = tpu.matmul %5, %21, %cst_19 {dimension_numbers = #tpu.dot_dimension_numbers<[1], [0], [0], [1], [0, 0, 1, 1], [], []>} : vector<8x32xbf16>, vector<32x32xbf16>, vector<8x32xf32> -> vector<8x32xf32>
    %c0_20 = arith.constant 0 : index
    %c0_21 = arith.constant 0 : index
    %c0_22 = arith.constant 0 : index
    %23 = vector.load %arg9[%c0_20, %c0_21, %c0_22] : memref<1x1x32xf32, #tpu.memory_space<vmem>>, vector<1x1x32xf32>
    %24 = vector.shape_cast %23 : vector<1x1x32xf32> to vector<1x32xf32>
    %25 = vector.broadcast %24 : vector<1x32xf32> to vector<8x32xf32>
    %26 = arith.addf %22, %25 : vector<8x32xf32>
    %cst_23 = arith.constant 0.353553385 : f32
    %27 = vector.broadcast %cst_23 : f32 to vector<8x32xf32>
    %28 = arith.mulf %12, %27 : vector<8x32xf32>
    %29 = vector.shape_cast %28 : vector<8x32xf32> to vector<1x8x4x8xf32>
    %30 = arith.truncf %29 : vector<1x8x4x8xf32> to vector<1x8x4x8xbf16>
    %31 = vector.shape_cast %19 : vector<8x32xf32> to vector<1x8x4x8xf32>
    %32 = arith.truncf %31 : vector<1x8x4x8xf32> to vector<1x8x4x8xbf16>
    %33 = vector.shape_cast %26 : vector<8x32xf32> to vector<1x8x4x8xf32>
    %34 = arith.truncf %33 : vector<1x8x4x8xf32> to vector<1x8x4x8xbf16>
    %c0_24 = arith.constant 0 : index
    %c0_25 = arith.constant 0 : index
    %35 = vector.load %arg3[%c0_24, %c0_25] : memref<8x8xf32, #tpu.memory_space<vmem>>, vector<8x8xf32>
    %36 = vector.shape_cast %30 : vector<1x8x4x8xbf16> to vector<8x4x8xbf16>
    %37 = vector.shape_cast %32 : vector<1x8x4x8xbf16> to vector<8x4x8xbf16>
    "tpu.trace_start"() <{level = 10 : i32, message = "qhd,khd->hqk"}> : () -> ()
    %cst_26 = arith.constant dense<0.000000e+00> : vector<4x8x8xf32>
    %38 = tpu.matmul %36, %37, %cst_26 {dimension_numbers = #tpu.dot_dimension_numbers<[2], [2], [0], [0], [0, 1, 0, 0, 1, 0], [1], [1]>} : vector<8x4x8xbf16>, vector<8x4x8xbf16>, vector<4x8x8xf32> -> vector<4x8x8xf32>
    "tpu.trace_stop"() : () -> ()
    %39 = vector.shape_cast %35 : vector<8x8xf32> to vector<1x8x8xf32>
    %40 = vector.broadcast %39 : vector<1x8x8xf32> to vector<4x8x8xf32>
    %41 = arith.addf %38, %40 : vector<4x8x8xf32>
    %cst_27 = arith.constant dense<0xFF800000> : vector<4x8xf32>
    %42 = vector.multi_reduction <maximumf>, %41, %cst_27 [2] : vector<4x8x8xf32> to vector<4x8xf32>
    %43 = vector.shape_cast %42 : vector<4x8xf32> to vector<4x8x1xf32>
    %44 = vector.broadcast %43 : vector<4x8x1xf32> to vector<4x8x8xf32>
    %45 = arith.subf %41, %44 : vector<4x8x8xf32>
    %46 = math.exp %45 : vector<4x8x8xf32>
    %cst_28 = arith.constant dense<0.000000e+00> : vector<4x8xf32>
    %47 = vector.multi_reduction <add>, %46, %cst_28 [2] : vector<4x8x8xf32> to vector<4x8xf32>
    %48 = vector.shape_cast %47 : vector<4x8xf32> to vector<4x8x1xf32>
    %49 = tpu.reciprocal %48 {approx = true} : vector<4x8x1xf32> -> vector<4x8x1xf32>
    %50 = vector.broadcast %49 : vector<4x8x1xf32> to vector<4x8x8xf32>
    %51 = arith.mulf %46, %50 : vector<4x8x8xf32>
    %c0_29 = arith.constant 0 : index
    %c0_30 = arith.constant 0 : index
    %c0_31 = arith.constant 0 : index
    %c0_32 = arith.constant 0 : index
    %c0_33 = arith.constant 0 : index
    %52 = vector.load %arg21[%c0_29, %c0_30, %c0_31, %c0_32, %c0_33] : memref<1x1x4x8x8xf32, #tpu.memory_space<vmem>>, vector<1x1x4x8x8xf32>
    %53 = vector.shape_cast %52 : vector<1x1x4x8x8xf32> to vector<4x8x8xf32>
    %54 = vector.shape_cast %51 : vector<4x8x8xf32> to vector<1x1x4x8x8xf32>
    tpu.vector_store %arg21[%c0_29, %c0_30, %c0_31, %c0_32, %c0_33], %54 {strides = array<i32>} : memref<1x1x4x8x8xf32, #tpu.memory_space<vmem>>, vector<1x1x4x8x8xf32>,
    %55 = arith.truncf %51 : vector<4x8x8xf32> to vector<4x8x8xbf16>
    %56 = vector.shape_cast %34 : vector<1x8x4x8xbf16> to vector<8x4x8xbf16>
    "tpu.trace_start"() <{level = 10 : i32, message = "hqk,khd->qhd"}> : () -> ()
    %cst_34 = arith.constant dense<0.000000e+00> : vector<4x8x8xf32>
    %57 = tpu.matmul %56, %55, %cst_34 {dimension_numbers = #tpu.dot_dimension_numbers<[0], [2], [2], [1], [0, 1, 0, 2, 1, 1], [1], [0]>} : vector<8x4x8xbf16>, vector<4x8x8xbf16>, vector<4x8x8xf32> -> vector<4x8x8xf32>
    %58 = tpu.transpose %57, [2, 0, 1] : vector<4x8x8xf32> -> vector<8x4x8xf32>
    "tpu.trace_stop"() : () -> ()
    %59 = vector.shape_cast %58 : vector<8x4x8xf32> to vector<8x32xf32>
    %60 = arith.truncf %59 : vector<8x32xf32> to vector<8x32xbf16>
    %c0_35 = arith.constant 0 : index
    %c0_36 = arith.constant 0 : index
    %c0_37 = arith.constant 0 : index
    %61 = vector.load %arg10[%c0_35, %c0_36, %c0_37] : memref<1x32x32xbf16, #tpu.memory_space<vmem>>, vector<1x32x32xbf16>
    %62 = vector.shape_cast %61 : vector<1x32x32xbf16> to vector<32x32xbf16>
    %cst_38 = arith.constant dense<0.000000e+00> : vector<8x32xf32>
    %63 = tpu.matmul %60, %62, %cst_38 {dimension_numbers = #tpu.dot_dimension_numbers<[1], [0], [0], [1], [0, 0, 1, 1], [], []>} : vector<8x32xbf16>, vector<32x32xbf16>, vector<8x32xf32> -> vector<8x32xf32>
    %c0_39 = arith.constant 0 : index
    %c0_40 = arith.constant 0 : index
    %c0_41 = arith.constant 0 : index
    %64 = vector.load %arg11[%c0_39, %c0_40, %c0_41] : memref<1x1x32xf32, #tpu.memory_space<vmem>>, vector<1x1x32xf32>
    %65 = vector.shape_cast %64 : vector<1x1x32xf32> to vector<1x32xf32>
    %66 = vector.broadcast %65 : vector<1x32xf32> to vector<8x32xf32>
    %67 = arith.addf %63, %66 : vector<8x32xf32>
    %68 = arith.addf %4, %67 : vector<8x32xf32>
    %cst_42 = arith.constant dense<0.000000e+00> : vector<8xf32>
    %69 = vector.multi_reduction <add>, %68, %cst_42 [1] : vector<8x32xf32> to vector<8xf32>
    %70 = vector.shape_cast %69 : vector<8xf32> to vector<8x1xf32>
    %cst_43 = arith.constant 3.200000e+01 : f32
    %71 = vector.broadcast %cst_43 : f32 to vector<8x1xf32>
    %72 = arith.divf %70, %71 : vector<8x1xf32>
    %73 = vector.broadcast %72 : vector<8x1xf32> to vector<8x32xf32>
    %74 = arith.subf %68, %73 : vector<8x32xf32>
    %75 = arith.mulf %74, %74 : vector<8x32xf32>
    %cst_44 = arith.constant dense<0.000000e+00> : vector<8xf32>
    %76 = vector.multi_reduction <add>, %75, %cst_44 [1] : vector<8x32xf32> to vector<8xf32>
    %77 = vector.shape_cast %76 : vector<8xf32> to vector<8x1xf32>
    %cst_45 = arith.constant 3.200000e+01 : f32
    %78 = vector.broadcast %cst_45 : f32 to vector<8x1xf32>
    %79 = arith.divf %77, %78 : vector<8x1xf32>
    %80 = vector.broadcast %72 : vector<8x1xf32> to vector<8x32xf32>
    %81 = arith.subf %68, %80 : vector<8x32xf32>
    %cst_46 = arith.constant 9.99999974E-6 : f32
    %82 = vector.broadcast %cst_46 : f32 to vector<8x1xf32>
    %83 = arith.addf %79, %82 : vector<8x1xf32>
    %84 = math.rsqrt %83 : vector<8x1xf32>
    %85 = vector.broadcast %84 : vector<8x1xf32> to vector<8x32xf32>
    %86 = arith.mulf %81, %85 : vector<8x32xf32>
    %c0_47 = arith.constant 0 : index
    %c0_48 = arith.constant 0 : index
    %c0_49 = arith.constant 0 : index
    %87 = vector.load %arg12[%c0_47, %c0_48, %c0_49] : memref<1x1x32xf32, #tpu.memory_space<vmem>>, vector<1x1x32xf32>
    %88 = vector.shape_cast %87 : vector<1x1x32xf32> to vector<1x32xf32>
    %89 = vector.broadcast %88 : vector<1x32xf32> to vector<8x32xf32>
    %90 = arith.mulf %86, %89 : vector<8x32xf32>
    %c0_50 = arith.constant 0 : index
    %c0_51 = arith.constant 0 : index
    %c0_52 = arith.constant 0 : index
    %91 = vector.load %arg13[%c0_50, %c0_51, %c0_52] : memref<1x1x32xf32, #tpu.memory_space<vmem>>, vector<1x1x32xf32>
    %92 = vector.shape_cast %91 : vector<1x1x32xf32> to vector<1x32xf32>
    %93 = vector.broadcast %92 : vector<1x32xf32> to vector<8x32xf32>
    %94 = arith.addf %90, %93 : vector<8x32xf32>
    %95 = arith.truncf %94 : vector<8x32xf32> to vector<8x32xbf16>
    %c0_53 = arith.constant 0 : index
    %c0_54 = arith.constant 0 : index
    %c0_55 = arith.constant 0 : index
    %96 = vector.load %arg14[%c0_53, %c0_54, %c0_55] : memref<1x32x64xbf16, #tpu.memory_space<vmem>>, vector<1x32x64xbf16>
    %97 = vector.shape_cast %96 : vector<1x32x64xbf16> to vector<32x64xbf16>
    %cst_56 = arith.constant dense<0.000000e+00> : vector<8x64xf32>
    %98 = tpu.matmul %95, %97, %cst_56 {dimension_numbers = #tpu.dot_dimension_numbers<[1], [0], [0], [1], [0, 0, 1, 1], [], []>} : vector<8x32xbf16>, vector<32x64xbf16>, vector<8x64xf32> -> vector<8x64xf32>
    %c0_57 = arith.constant 0 : index
    %c0_58 = arith.constant 0 : index
    %c0_59 = arith.constant 0 : index
    %99 = vector.load %arg15[%c0_57, %c0_58, %c0_59] : memref<1x1x64xf32, #tpu.memory_space<vmem>>, vector<1x1x64xf32>
    %100 = vector.shape_cast %99 : vector<1x1x64xf32> to vector<1x64xf32>
    %101 = vector.broadcast %100 : vector<1x64xf32> to vector<8x64xf32>
    %102 = arith.addf %98, %101 : vector<8x64xf32>
    %cst_60 = arith.constant 0.000000e+00 : f32
    %103 = vector.broadcast %cst_60 : f32 to vector<8x64xf32>
    %104 = arith.maximumf %102, %103 : vector<8x64xf32>
    %105 = arith.truncf %104 : vector<8x64xf32> to vector<8x64xbf16>
    %c0_61 = arith.constant 0 : index
    %c0_62 = arith.constant 0 : index
    %c0_63 = arith.constant 0 : index
    %106 = vector.load %arg16[%c0_61, %c0_62, %c0_63] : memref<1x64x32xbf16, #tpu.memory_space<vmem>>, vector<1x64x32xbf16>
    %107 = vector.shape_cast %106 : vector<1x64x32xbf16> to vector<64x32xbf16>
    %cst_64 = arith.constant dense<0.000000e+00> : vector<8x32xf32>
    %108 = tpu.matmul %105, %107, %cst_64 {dimension_numbers = #tpu.dot_dimension_numbers<[1], [0], [0], [1], [0, 0, 1, 1], [], []>} : vector<8x64xbf16>, vector<64x32xbf16>, vector<8x32xf32> -> vector<8x32xf32>
    %c0_65 = arith.constant 0 : index
    %c0_66 = arith.constant 0 : index
    %c0_67 = arith.constant 0 : index
    %109 = vector.load %arg17[%c0_65, %c0_66, %c0_67] : memref<1x1x32xf32, #tpu.memory_space<vmem>>, vector<1x1x32xf32>
    %110 = vector.shape_cast %109 : vector<1x1x32xf32> to vector<1x32xf32>
    %111 = vector.broadcast %110 : vector<1x32xf32> to vector<8x32xf32>
    %112 = arith.addf %108, %111 : vector<8x32xf32>
    %113 = arith.addf %94, %112 : vector<8x32xf32>
    %cst_68 = arith.constant dense<0.000000e+00> : vector<8xf32>
    %114 = vector.multi_reduction <add>, %113, %cst_68 [1] : vector<8x32xf32> to vector<8xf32>
    %115 = vector.shape_cast %114 : vector<8xf32> to vector<8x1xf32>
    %cst_69 = arith.constant 3.200000e+01 : f32
    %116 = vector.broadcast %cst_69 : f32 to vector<8x1xf32>
    %117 = arith.divf %115, %116 : vector<8x1xf32>
    %118 = vector.broadcast %117 : vector<8x1xf32> to vector<8x32xf32>
    %119 = arith.subf %113, %118 : vector<8x32xf32>
    %120 = arith.mulf %119, %119 : vector<8x32xf32>
    %cst_70 = arith.constant dense<0.000000e+00> : vector<8xf32>
    %121 = vector.multi_reduction <add>, %120, %cst_70 [1] : vector<8x32xf32> to vector<8xf32>
    %122 = vector.shape_cast %121 : vector<8xf32> to vector<8x1xf32>
    %cst_71 = arith.constant 3.200000e+01 : f32
    %123 = vector.broadcast %cst_71 : f32 to vector<8x1xf32>
    %124 = arith.divf %122, %123 : vector<8x1xf32>
    %125 = vector.broadcast %117 : vector<8x1xf32> to vector<8x32xf32>
    %126 = arith.subf %113, %125 : vector<8x32xf32>
    %cst_72 = arith.constant 9.99999974E-6 : f32
    %127 = vector.broadcast %cst_72 : f32 to vector<8x1xf32>
    %128 = arith.addf %124, %127 : vector<8x1xf32>
    %129 = math.rsqrt %128 : vector<8x1xf32>
    %130 = vector.broadcast %129 : vector<8x1xf32> to vector<8x32xf32>
    %131 = arith.mulf %126, %130 : vector<8x32xf32>
    %c0_73 = arith.constant 0 : index
    %c0_74 = arith.constant 0 : index
    %c0_75 = arith.constant 0 : index
    %132 = vector.load %arg18[%c0_73, %c0_74, %c0_75] : memref<1x1x32xf32, #tpu.memory_space<vmem>>, vector<1x1x32xf32>
    %133 = vector.shape_cast %132 : vector<1x1x32xf32> to vector<1x32xf32>
    %134 = vector.broadcast %133 : vector<1x32xf32> to vector<8x32xf32>
    %135 = arith.mulf %131, %134 : vector<8x32xf32>
    %c0_76 = arith.constant 0 : index
    %c0_77 = arith.constant 0 : index
    %c0_78 = arith.constant 0 : index
    %136 = vector.load %arg19[%c0_76, %c0_77, %c0_78] : memref<1x1x32xf32, #tpu.memory_space<vmem>>, vector<1x1x32xf32>
    %137 = vector.shape_cast %136 : vector<1x1x32xf32> to vector<1x32xf32>
    %138 = vector.broadcast %137 : vector<1x32xf32> to vector<8x32xf32>
    %139 = arith.addf %135, %138 : vector<8x32xf32>
    %140 = vector.shape_cast %139 : vector<8x32xf32> to vector<1x8x32xf32>
    %c0_79 = arith.constant 0 : index
    %c0_80 = arith.constant 0 : index
    %c0_81 = arith.constant 0 : index
    %141 = vector.load %arg20[%c0_79, %c0_80, %c0_81] : memref<1x8x32xf32, #tpu.memory_space<vmem>>, vector<1x8x32xf32>
    tpu.vector_store %arg20[%c0_79, %c0_80, %c0_81], %140 {strides = array<i32>} : memref<1x8x32xf32, #tpu.memory_space<vmem>>, vector<1x8x32xf32>,
    return
  }
  func.func @transform_0(%arg0: i32, %arg1: i32) -> (i32, i32, i32) {
    %c0_i32 = arith.constant 0 : i32
    %c0_i32_0 = arith.constant 0 : i32
    %c0_i32_1 = arith.constant 0 : i32
    return %arg0, %c0_i32, %c0_i32_0 : i32, i32, i32
  }
  func.func @transform_1(%arg0: i32, %arg1: i32) -> (i32, i32) {
    %c0_i32 = arith.constant 0 : i32
    %c0_i32_0 = arith.constant 0 : i32
    %c0_i32_1 = arith.constant 0 : i32
    return %c0_i32, %c0_i32_0 : i32, i32
  }
  func.func @transform_2(%arg0: i32, %arg1: i32) -> (i32, i32, i32) {
    %c0_i32 = arith.constant 0 : i32
    %c0_i32_0 = arith.constant 0 : i32
    %c0_i32_1 = arith.constant 0 : i32
    return %arg1, %c0_i32, %c0_i32_0 : i32, i32, i32
  }
  func.func @transform_3(%arg0: i32, %arg1: i32) -> (i32, i32, i32) {
    %c0_i32 = arith.constant 0 : i32
    %c0_i32_0 = arith.constant 0 : i32
    %c0_i32_1 = arith.constant 0 : i32
    return %arg1, %c0_i32, %c0_i32_0 : i32, i32, i32
  }
  func.func @transform_4(%arg0: i32, %arg1: i32) -> (i32, i32, i32) {
    %c0_i32 = arith.constant 0 : i32
    %c0_i32_0 = arith.constant 0 : i32
    %c0_i32_1 = arith.constant 0 : i32
    return %arg1, %c0_i32, %c0_i32_0 : i32, i32, i32
  }
  func.func @transform_5(%arg0: i32, %arg1: i32) -> (i32, i32, i32) {
    %c0_i32 = arith.constant 0 : i32
    %c0_i32_0 = arith.constant 0 : i32
    %c0_i32_1 = arith.constant 0 : i32
    return %arg1, %c0_i32, %c0_i32_0 : i32, i32, i32
  }
  func.func @transform_6(%arg0: i32, %arg1: i32) -> (i32, i32, i32) {
    %c0_i32 = arith.constant 0 : i32
    %c0_i32_0 = arith.constant 0 : i32
    %c0_i32_1 = arith.constant 0 : i32
    return %arg1, %c0_i32, %c0_i32_0 : i32, i32, i32
  }
  func.func @transform_7(%arg0: i32, %arg1: i32) -> (i32, i32, i32) {
    %c0_i32 = arith.constant 0 : i32
    %c0_i32_0 = arith.constant 0 : i32
    %c0_i32_1 = arith.constant 0 : i32
    return %arg1, %c0_i32, %c0_i32_0 : i32, i32, i32
  }
  func.func @transform_8(%arg0: i32, %arg1: i32) -> (i32, i32, i32) {
    %c0_i32 = arith.constant 0 : i32
    %c0_i32_0 = arith.constant 0 : i32
    %c0_i32_1 = arith.constant 0 : i32
    return %arg1, %c0_i32, %c0_i32_0 : i32, i32, i32
  }
  func.func @transform_9(%arg0: i32, %arg1: i32) -> (i32, i32, i32) {
    %c0_i32 = arith.constant 0 : i32
    %c0_i32_0 = arith.constant 0 : i32
    %c0_i32_1 = arith.constant 0 : i32
    return %arg1, %c0_i32, %c0_i32_0 : i32, i32, i32
  }
  func.func @transform_10(%arg0: i32, %arg1: i32) -> (i32, i32, i32) {
    %c0_i32 = arith.constant 0 : i32
    %c0_i32_0 = arith.constant 0 : i32
    %c0_i32_1 = arith.constant 0 : i32
    return %arg1, %c0_i32, %c0_i32_0 : i32, i32, i32
  }
  func.func @transform_11(%arg0: i32, %arg1: i32) -> (i32, i32, i32) {
    %c0_i32 = arith.constant 0 : i32
    %c0_i32_0 = arith.constant 0 : i32
    %c0_i32_1 = arith.constant 0 : i32
    return %arg1, %c0_i32, %c0_i32_0 : i32, i32, i32
  }
  func.func @transform_12(%arg0: i32, %arg1: i32) -> (i32, i32, i32) {
    %c0_i32 = arith.constant 0 : i32
    %c0_i32_0 = arith.constant 0 : i32
    %c0_i32_1 = arith.constant 0 : i32
    return %arg1, %c0_i32, %c0_i32_0 : i32, i32, i32
  }
  func.func @transform_13(%arg0: i32, %arg1: i32) -> (i32, i32, i32) {
    %c0_i32 = arith.constant 0 : i32
    %c0_i32_0 = arith.constant 0 : i32
    %c0_i32_1 = arith.constant 0 : i32
    return %arg1, %c0_i32, %c0_i32_0 : i32, i32, i32
  }
  func.func @transform_14(%arg0: i32, %arg1: i32) -> (i32, i32, i32) {
    %c0_i32 = arith.constant 0 : i32
    %c0_i32_0 = arith.constant 0 : i32
    %c0_i32_1 = arith.constant 0 : i32
    return %arg1, %c0_i32, %c0_i32_0 : i32, i32, i32
  }
  func.func @transform_15(%arg0: i32, %arg1: i32) -> (i32, i32, i32) {
    %c0_i32 = arith.constant 0 : i32
    %c0_i32_0 = arith.constant 0 : i32
    %c0_i32_1 = arith.constant 0 : i32
    return %arg1, %c0_i32, %c0_i32_0 : i32, i32, i32
  }
  func.func @transform_16(%arg0: i32, %arg1: i32) -> (i32, i32, i32) {
    %c0_i32 = arith.constant 0 : i32
    %c0_i32_0 = arith.constant 0 : i32
    %c0_i32_1 = arith.constant 0 : i32
    return %arg1, %c0_i32, %c0_i32_0 : i32, i32, i32
  }
  func.func @transform_17(%arg0: i32, %arg1: i32) -> (i32, i32, i32) {
    %c0_i32 = arith.constant 0 : i32
    %c0_i32_0 = arith.constant 0 : i32
    %c0_i32_1 = arith.constant 0 : i32
    return %arg1, %c0_i32, %c0_i32_0 : i32, i32, i32
  }
  func.func @transform_18(%arg0: i32, %arg1: i32) -> (i32, i32, i32) {
    %c0_i32 = arith.constant 0 : i32
    %c0_i32_0 = arith.constant 0 : i32
    %c0_i32_1 = arith.constant 0 : i32
    return %arg0, %c0_i32, %c0_i32_0 : i32, i32, i32
  }
  func.func @transform_19(%arg0: i32, %arg1: i32) -> (i32, i32, i32, i32, i32) {
    %c0_i32 = arith.constant 0 : i32
    %c0_i32_0 = arith.constant 0 : i32
    %c0_i32_1 = arith.constant 0 : i32
    %c0_i32_2 = arith.constant 0 : i32
    return %arg1, %arg0, %c0_i32, %c0_i32_0, %c0_i32_1 : i32, i32, i32, i32, i32
  }
}

</mosaic_0001>

<bundles_post_ra>
// kernel: transformer_encoder2.1
= control target key start
LH: loop header
LB: loop body
LE: loop exit
PB: predicated region body
PF: predicated region fallthrough
CT: control target
= control target key end

     0   :  { %s4115_s0 = inlined_call_operand.vmem [shape: f32[2,8,32], index: 0, kind: input, shape index: {}]   ;;  %s4116_s1 = inlined_call_operand.vmem [shape: f32[8,8], index: 1, kind: input, shape index: {}]   ;;  %s4117_s2 = inlined_call_operand.vmem [shape: bf16[2,32,32], index: 2, kind: input, shape index: {}]   ;;  %s4118_s3 = inlined_call_operand.vmem [shape: f32[2,1,32], index: 3, kind: input, shape index: {}]   ;;  %s4119_s4 = inlined_call_operand.vmem [shape: bf16[2,32,32], index: 4, kind: input, shape index: {}]   ;;  %s4120_s5 = inlined_call_operand.vmem [shape: f32[2,1,32], index: 5, kind: input, shape index: {}]   ;;  %s4121_s6 = inlined_call_operand.vmem [shape: bf16[2,32,32], index: 6, kind: input, shape index: {}]   ;;  %s4122_s7 = inlined_call_operand.vmem [shape: f32[2,1,32], index: 7, kind: input, shape index: {}]   ;;  %s4123_s8 = inlined_call_operand.vmem [shape: bf16[2,32,32], index: 8, kind: input, shape index: {}]   ;;  %s4124_s9 = inlined_call_operand.vmem [shape: f32[2,1,32], index: 9, kind: input, shape index: {}]   ;;  %s4125_s10 = inlined_call_operand.vmem [shape: f32[2,1,32], index: 10, kind: input, shape index: {}]   ;;  %s4126_s11 = inlined_call_operand.vmem [shape: f32[2,1,32], index: 11, kind: input, shape index: {}]   ;;  %s4127_s12 = inlined_call_operand.vmem [shape: bf16[2,32,64], index: 12, kind: input, shape index: {}]   ;;  %s4128_s13 = inlined_call_operand.vmem [shape: f32[2,1,64], index: 13, kind: input, shape index: {}]   ;;  %s4129_s14 = inlined_call_operand.vmem [shape: bf16[2,64,32], index: 14, kind: input, shape index: {}]   ;;  %s4130_s15 = inlined_call_operand.vmem [shape: f32[2,1,32], index: 15, kind: input, shape index: {}]   ;;  %s4131_s16 = inlined_call_operand.vmem [shape: f32[2,1,32], index: 16, kind: input, shape index: {}]   ;;  %s4132_s17 = inlined_call_operand.vmem [shape: f32[2,1,32], index: 17, kind: input, shape index: {}]   ;;  %s4133_s18 = inlined_call_operand.hbm [shape: f32[2,8,32], index: 18, kind: output, shape index: {0}]   ;;  %s4134_s19 = inlined_call_operand.vmem [shape: f32[2,2,4,8,8], index: 19, kind: output, shape index: {1}]  }
   0x1   :  { %4152 = sst [smem:[#allocation20_spill]] %s4115_s0 }
   0x2   :  { %4153 = sst [smem:[#allocation21_spill]] %s4116_s1 }
   0x3   :  { %4154 = sst [smem:[#allocation22_spill]] %s4117_s2 }
   0x4   :  { %4155 = sst [smem:[#allocation23_spill]] %s4118_s3 }
   0x5   :  { %4156 = sst [smem:[#allocation24_spill]] %s4119_s4 }
   0x6   :  { %4157 = sst [smem:[#allocation25_spill]] %s4121_s6 }
   0x7   :  { %4158 = sst [smem:[#allocation26_spill]] %s4123_s8 }
   0x8   :  { %4159 = sst [smem:[#allocation27_spill]] %s4124_s9 }
   0x9   :  { %4160 = sst [smem:[#allocation28_spill]] %s4125_s10 }
   0xa   :  { %4161 = sst [smem:[#allocation29_spill]] %s4126_s11 }
   0xb   :  { %4162 = sst [smem:[#allocation30_spill]] %s4127_s12 }
   0xc   :  { %4163 = sst [smem:[#allocation31_spill]] %s4128_s13 }
   0xd   :  { %4164 = sst [smem:[#allocation32_spill]] %s4129_s14 }
   0xe   :  { %4165 = sst [smem:[#allocation33_spill]] %s4130_s15 }
   0xf   :  { %4166 = sst [smem:[#allocation34_spill]] %s4131_s16 }
  0x10   :  { %4167 = sst [smem:[#allocation35_spill]] %s4132_s17 }
  0x11   :  { %4168 = sst [smem:[#allocation36_spill]] %s4133_s18 }
  0x12   :  { %4169 = sst [smem:[#allocation37_spill]] %s4134_s19 }
  0x13   :  { %25 = vsyncpa [#allocation3], 0 }
  0x14   :  { %27 = vsyncpa [#allocation3 + $0x1], 0  ;;  %s3545_s0 = smov 0   ;;  %s3547_s30 = smov 0  }
  0x15   :  { %s3549_s20 = smov 0   ;;  %s3551_s21 = smov 0  }
  0x16   :  { %s3553_s1 = smov 0   ;;  %s3555_s22 = smov 0  }
  0x17   :  { %s3557_s2 = smov 0   ;;  %s3559_s23 = smov 0  }
  0x18 LB: > { %4170 = sst [smem:[#allocation5_spill]] %s3406_s0  ;;  %s3041_s24 = sadd.s32 4294967295, %s3434_s23   ;;  %s3434_s23 = sphi %s3559_s23, %s33_s23   ;;  %s3430_s2 = sphi %s3557_s2, %s4236_s2   ;;  %s3426_s22 = sphi %s3555_s22, %s4235_s22   ;;  %s3422_s1 = sphi %s3553_s1, %s4234_s1   ;;  %s3418_s21 = sphi %s3551_s21, %s4233_s21   ;;  %s3414_s20 = sphi %s3549_s20, %s4232_s20   ;;  %s3410_s30 = sphi %s3547_s30, %s4231_s30   ;;  %s3406_s0 = sphi %s3545_s0, %s4230_s0  }
  0x19   : > { %4171 = sst [smem:[#allocation6_spill]] %s3410_s30  ;;  %s3042_s25 = sadd.s32 4294967294, %s3434_s23  }
  0x1a   : > { %4172 = sst [smem:[#allocation7_spill]] %s3414_s20  ;;  %s42_s3 = sadd.s32 1, %s3426_s22 }
  0x1b   : > { %4173 = sst [smem:[#allocation8_spill]] %s3418_s21  ;;  %p43_p0 = scmp.ge.s32.totalorder %s42_s3, 2 }
  0x1c   : > { %4174 = sst [smem:[#allocation9_spill]] %s3422_s1  ;;  %s45_s26 = sadd.s32 1, %s3430_s2 }
  0x1d   : > { %4175 = sst [smem:[#allocation10_spill]] %s3426_s22  ;;  %p525_p1 = scmp.ne.s32.totalorder %s3414_s20, %s3410_s30 }
  0x1e   : > { %4176 = sst [smem:[#allocation11_spill]] %s3430_s2  ;;  %p526_p2 = scmp.eq.s32.totalorder %s3041_s24, 3 }
  0x1f   : > { %4177 = sst [smem:[#allocation12_spill]] %s3434_s23  ;;  %s4238_s3 = smov (%p43_p0, %s42_s3), 0 }
  0x20   : > { %4178 = sst [smem:[#allocation13_spill]] %s4238_s3  ;;  %s4240_s26 = smov (!%p43_p0, %s45_s26), %s3430_s2 }
  0x21   : > { %p3594_p3 = por %p526_p2, %p525_p1  ;;  %p531_p4 = scmp.ne.s32.totalorder %s3410_s30, %s3406_s0 }
  0x22   : > { %p47_p5 = scmp.ge.s32.totalorder %s4240_s26, 2  ;;  %p532_p6 = scmp.eq.s32.totalorder %s3042_s25, 3 }
  0x23   : > { %s4179_s27 = scalar_select %p3594_p3, 1, 0 }
  0x24   : > { %p3045_p7 = scmp.ge.s32.totalorder %s3434_s23, 1  ;;  %p696_p8 = scmp.lt.s32.totalorder %s3434_s23, 5 }
  0x25   : > { %4180 = sst [smem:[#allocation14_spill]] %s4179_s27  ;;  %s4242_s26 = smov (%p47_p5, %s4240_s26), 0 }
  0x26   : > { %4181 = sst [smem:[#allocation15_spill]] %s4242_s26  ;;  %p3604_p9 = por %p532_p6, %p531_p4 }
  0x27   : > { %p697_p10 = pnand %p3045_p7, %p696_p8  ;;  %s512_s29 = ssub.s32 %s3430_s2, %s4242_s26 }
  0x28   : > { %s4182_s28 = scalar_select %p3604_p9, 1, 0 }
  0x29   : > { %s515_s24 = sadd.s32 1, %s3414_s20  ;;  %p513_p11 = scmp.eq.s32.totalorder %s512_s29, 0 }
  0x2a   : > { %4183 = sst [smem:[#allocation16_spill]] %s4182_s28  ;;  %700 = sbr.rel (%p697_p10) target bundleno = 2918 (0xb66), region = 92 }
  0x2b   : > { %s3612_s3 = scalar_select %p513_p11, %s3414_s20, %s515_s24  }
  0x2d   : > { %4184 = sst [smem:[#allocation17_spill]] %s3612_s3 }
  0x2f   : > { %s4140_s25 = sand.u32 1, %s3410_s30   ;;  %p820_p12 = scmp.lt.s32.totalorder %s3422_s1, 1 }
  0x30   : > { %s3618_s22 = sshll.u32 %s4140_s25, 3  ;;  %p824_p13 = scmp.lt.s32.totalorder %s3418_s21, 1 }
  0x31   : > { %s821_s28 = scalar_select %p820_p12, %s3422_s1, 1 }
  0x32   : > { %s3623_s0 = scalar_select %p824_p13, %s3418_s21, 1 }
  0x33   : > { %s3047_s29 = sshll.u32 %s821_s28, 3  ;;  %s3060_s24 = sshll.u32 %s821_s28, 2 }
  0x34   : > { %s4185_s3 = sld [smem:[#allocation20_spill]]  ;;  %s3138_s20 = sshll.u32 %s3623_s0, 4 }
  0x35   : > { %s4186_s18 = sld [smem:[#allocation22_spill]]  ;;  %s3061_s1 = sshll.u32 %s3623_s0, 3 }
  0x36   : > { %s4188_s4 = sld [smem:[#allocation24_spill]]  ;;  %s890_s19 = sadd.s32 %s3061_s1, %s3060_s24 }
  0x37   : > { %s4189_s6 = sld [smem:[#allocation25_spill]]  ;;  %s3705_s16 = scalar_lea.vmem [#allocation2], %s3618_s22 }
  0x38   : > { %s4190_s8 = sld [smem:[#allocation26_spill]] }
  0x39   : > { %s4195_s12 = sld [smem:[#allocation30_spill]] }
  0x3a   : > { %s823_s25 = scalar_lea.vmem %s4185_s3, %s3047_s29  ;;  %s4198_s2 = sld [smem:[#allocation33_spill]] }
  0x3b   : > { %s3632_s30 = scalar_lea.vmem %s4186_s18, %s3138_s20  ;;  %s4199_s15 = sld [smem:[#allocation32_spill]] }
  0x3c   : > { %s836_s28 = scalar_lea.vmem %s4188_s4, %s3138_s20  ;;  %s4202_s17 = sld [smem:[#allocation37_spill]] }
  0x3d   : > { %s3648_s23 = scalar_lea.vmem %s4189_s6, %s3138_s20  ;;  %s4200_s6 = sld [smem:[#allocation34_spill]] }
  0x3e   : > { %s3657_s14 = scalar_lea.vmem %s4190_s8, %s3138_s20  ;;  %s3062_s8 = sshll.u32 %s890_s19, 3 }
  0x3f   : > { %4191 = sst [smem:[#allocation18_spill]] %s3657_s14  ;;  %s3674_s21 = scalar_lea.vmem %s4195_s12, %s3138_s20 }
  0x40   : > { %4196 = sst [smem:[#allocation19_spill]] %s3674_s21  ;;  %s3143_s14 = sshll.u32 %s3623_s0, 5 }
  0x41   : > { %s877_s9 = scalar_lea.vmem %s4198_s2, %s3623_s0  ;;  %s3688_s10 = scalar_lea.vmem %s4199_s15, %s3143_s14 }
  0x42   : > { %s4201_s12 = sld [smem:[#allocation35_spill]]  ;;  %s3702_s2 = scalar_lea.vmem %s4202_s17, %s3062_s8 }
  0x43   : > { %s880_s18 = scalar_lea.vmem %s4200_s6, %s3623_s0  ;;  %s4203_s14 = sld [smem:[#allocation8_spill]] }
  0x48   : > { %s883_s11 = scalar_lea.vmem %s4201_s12, %s3623_s0 }
  0x49   : > { %p3063_p0 = scmp.ne.s32.totalorder %s4203_s14, 0 }
  0x4b   : > { %897 = sbr.rel (%p3063_p0) target bundleno = 82 (0x52), region = 96 }
  0x50   : > { %v898_v0 = vld [vmem:[%s823_s25] sm:$0xff]  ;;  %vm899_vm0 = vcmask 261120  }
  0x51   : > { %900 = vst.msk [vmem:[%s3705_s16] sm:$0xff] %vm899_vm0, %v898_v0 }
  0x52 PF: > { %v3145_v1 = vld [vmem:[%s3632_s30 + $0x8] sm:$0xff]  ;;  %v3144_v3 = vld [vmem:[%s3632_s30] sm:$0xff]  ;;  %vm923_vm1 = vcmask 261120   ;;  %s4204_s12 = sld [smem:[#allocation23_spill]]  ;;  %s4206_s25 = scalar_lea.vmem %s4120_s5, %s3623_s0  ;;  %v3439_v20 = vmov 1983009808  }
  0x53   : > { %v3147_v2 = vld [vmem:[%s836_s28 + $0x8] sm:$0xff]  ;;  %v3146_v4 = vld [vmem:[%s836_s28] sm:$0xff]  ;;  %933 = vmatpush.bf16.msra.mxu0 %v3145_v1  ;;  %s3436_s24 = smov 112   ;;  %s3437_s28 = smov 104   ;;  %v1023_v21 = vunpack.c.l.s4 %v3439_v20  ;;  %vm1018_vm2 = vcmask 1047556   ;;  %vm1684_vm3 = vcmask 1043456  }
  0x54   : > { %966 = vmatpush.bf16.msra.mxu1 %v3147_v2  ;;  %v3308_v8 = vld [vmem:[%s4206_s25] ss:$0 sm:$0xff]  ;;  %s3438_s21 = smov 120   ;;  %v3440_v26 = vmov 1934713408   ;;  %v3149_v43 = vld [vmem:[%s3648_s23 + $0x8] sm:$0xff]  ;;  %s4207_s3 = scalar_lea.vmem %s4122_s7, %s3623_s0 }
  0x55   : > { %v3739_v24 = vunpack.c.0.s8 %v1023_v21  ;;  %v1047_v27 = vunpack.c.l.s4 %v3440_v26  ;;  %999 = vmatpush.bf16.msra.mxu2 %v3149_v43  ;;  %v3148_v47 = vld [vmem:[%s3648_s23] sm:$0xff]  ;;  %vm1680_vm4 = vcmask 64512   ;;  %s4208_s29 = sld [smem:[#allocation21_spill]]  ;;  %s3441_s27 = smov 24   ;;  %vm2533_vm5 = vcmask 130048  }
  0x56   : > { %s4209_s20 = sld [smem:[#allocation18_spill]]  ;;  %s3442_s1 = smov 16   ;;  %vm2535_vm6 = vcmask 195584   ;;  %vm2689_vm11 = vcmask 523264  }
  0x57   : > { %934 = vmatpush.bf16.msra.mxu0 %v3144_v3  ;;  %v3748_v35 = vunpack.c.0.s8 %v1047_v27  ;;  %s3443_s19 = smov 8   ;;  %s4210_s14 = sld [smem:[#allocation27_spill]] }
  0x58   : > { %v901_v5 = vld [vmem:[%s3705_s16] sm:$0xff]  ;;  %967 = vmatpush.bf16.msra.mxu1 %v3146_v4  ;;  %s4205_s13 = scalar_lea.vmem %s4204_s12, %s3623_s0  ;;  %s4212_s8 = sld [smem:[#allocation19_spill]] }
  0x59   : > { %v3712_v6 = vpack.c.bf16 %v901_v5, %v901_v5  ;;  %v3307_v7 = vld [vmem:[%s4205_s13] ss:$0 sm:$0xff]  ;;  %1000 = vmatpush.bf16.msra.mxu2 %v3148_v47  ;;  %s4213_s30 = sld [smem:[#allocation28_spill]]  ;;  %s2762_s25 = sshll.u32 %s3705_s16, 4  ;;  %s2763_s25 = int_to_ptr.vmem [resolvable:$true] %s2762_s25 }
  0x5b   : > { %3072 = vmatmul.msk.bf16.vlgmr.msra.gmra.mxu0 %vm923_vm1, %v3712_v6  ;;  %3081 = vmatmul.msk.bf16.vlgmr.msra.gmra.mxu1 %vm923_vm1, %v3712_v6 }
  0x5c   : > { %3090 = vmatmul.msk.bf16.vlgmr.msra.gmra.mxu2 %vm923_vm1, %v3712_v6 }
  0x5d   : > { %s4211_s6 = scalar_lea.vmem %s4210_s14, %s3623_s0 }
  0x5f   : > { %s4214_s22 = scalar_lea.vmem %s4213_s30, %s3623_s0 }
  0xd8   : > { %v936_v9 = vpop.f32.mrf.mxu0  ;;  %v969_v10 = vpop.f32.mrf.mxu1 }
  0xd9   : > { %v937_v11 = vadd.f32 %v3307_v7, %v936_v9  ;;  %v970_v12 = vadd.f32 %v3308_v8, %v969_v10 }
  0xdb   : > { %v3728_v13 = vmul.f32 0.35355338, %v937_v11  ;;  %1086 = vrot.lane.b32.xlu1 %v970_v12, %s3436_s24  ;;  %1089 = vrot.lane.b32.xlu0 %v970_v12, %s3437_s28  ;;  %v1094_v23 = vrot.slane %v970_v12, 4 }
  0xdd   : > { %1011 = vrot.lane.b32.xlu2 %v3728_v13, %s3436_s24  ;;  %v3240_v16 = vpack.i.bf16 %v3728_v13, %v970_v12 }
  0xe0   : > { %v938_v14 = vpop.f32.mrf.mxu0  ;;  %v971_v15 = vpop.f32.mrf.mxu1 }
  0xe3   : > { %3241 = vrot.lane.b32.xlu0 %v3240_v16, %s3438_s21 }
  0xeb   : > { %1014 = vrot.lane.b32.xlu0 %v3728_v13, %s3437_s28 }
 0x137   : > { %v3769_v5 = vpop.permute.xlu2 %1011 }
 0x14d   : > { %v1087_v17 = vpop.permute.xlu1 %1086  ;;  %v1090_v18 = vpop.permute.xlu0 %1089 }
 0x14e   : > { %v1092_v19 = vrot.slane %v1087_v17, 4  ;;  %v1095_v25 = vsel %vm1018_vm2, %v1087_v17, %v1094_v23  ;;  %v1104_v30 = vrot.slane %v1090_v18, 4 }
 0x14f   : > { %v1103_v32 = vperm.slane %v1095_v25, %v3739_v24 }
 0x150   : > { %v1093_v22 = vsel %vm1018_vm2, %v1092_v19, %v970_v12 }
 0x151   : > { %v1099_v28 = vperm.slane %v1093_v22, %v3739_v24  ;;  %v1130_v39 = vrot.slane %v1103_v32, 4 }
 0x153   : > { %v1118_v36 = vrot.slane %v1099_v28, 4 }
 0x155   : > { %v3743_v29 = vpop.permute.xlu0 %3241 }
 0x156   : > { %v3243_v31 = vunpack.i.l.bf16 %v3743_v29 }
 0x158   : > { %v1105_v33 = vsel %vm1018_vm2, %v1104_v30, %v3243_v31  ;;  %v1106_v34 = vrot.slane %v3243_v31, 4 }
 0x159   : > { %v1111_v37 = vperm.slane %v1105_v33, %v3739_v24 }
 0x15a   : > { %v1107_v38 = vsel %vm1018_vm2, %v1090_v18, %v1106_v34 }
 0x15b   : > { %v1115_v40 = vperm.slane %v1107_v38, %v3739_v24  ;;  %v1119_v41 = vsel %vm1018_vm2, %v1111_v37, %v1118_v36  ;;  %v1116_v58 = vrot.slane %v1111_v37, 4 }
 0x15c   : > { %v1127_v42 = vperm.slane %v1119_v41, %v3748_v35 }
 0x15d   : > { %v1128_v44 = vrot.slane %v1115_v40, 4  ;;  %v1131_v45 = vsel %vm1018_vm2, %v1115_v40, %v1130_v39  ;;  %v1117_v63 = vsel %vm1018_vm2, %v1116_v58, %v1099_v28  ;;  %v3771_v6 = vpop.permute.xlu0 %1014 }
 0x15e   : > { %v1142_v46 = vrot.slane %v1127_v42, 4  ;;  %v1139_v48 = vperm.slane %v1131_v45, %v3748_v35  ;;  %v1150_v52 = vpack.c.bf16 %v1127_v42, %v1127_v42  ;;  %v1123_v0 = vperm.slane %v1117_v63, %v3748_v35 }
 0x15f   : > { %v1129_v49 = vsel %vm1018_vm2, %v1128_v44, %v1103_v32 }
 0x160   : > { %v1143_v50 = vsel %vm1018_vm2, 0.0, %v1142_v46  ;;  %v1135_v51 = vperm.slane %v1129_v49, %v3748_v35  ;;  %v1146_v54 = vrot.slane %v1139_v48, 4  ;;  %v1154_v59 = vpack.c.bf16 %v1139_v48, %v1139_v48 }
 0x161   : > { %v1151_v53 = vpack.c.bf16 %v1143_v50, %v1143_v50  ;;  %v1140_v1 = vrot.slane %v1123_v0, 4  ;;  %v1148_v3 = vpack.c.bf16 %v1123_v0, %v1123_v0 }
 0x162   : > { %v1144_v55 = vrot.slane %v1135_v51, 4  ;;  %v1147_v56 = vsel %vm1018_vm2, 0.0, %v1146_v54  ;;  %v1152_v62 = vpack.c.bf16 %v1135_v51, %v1135_v51  ;;  %v3309_v51 = vld [vmem:[%s4207_s3] ss:$0 sm:$0xff]  ;;  %s4217_s3 = sld [smem:[#allocation31_spill]] }
 0x163   : > { %3254 = vxpose.binary.xlu0.c.b16.start.end [1/2] (short) (narrow) %v1151_v53, %v1150_v52, 16  ;;  %v1155_v60 = vpack.c.bf16 %v1147_v56, %v1147_v56  ;;  %v1141_v2 = vsel %vm1018_vm2, 0.0, %v1140_v1  ;;  %v1002_v52 = vpop.f32.mrf.mxu2 }
 0x164   : > { %v1145_v57 = vsel %vm1018_vm2, 0.0, %v1144_v55  ;;  %v1149_v4 = vpack.c.bf16 %v1141_v2, %v1141_v2  ;;  %v3794_v53 = vadd.f32 %v3309_v51, %v1002_v52 }
 0x165   : > { %v1153_v61 = vpack.c.bf16 %v1145_v57, %v1145_v57  ;;  %3245 = vxpose.binary.xlu2.c.b16.start.end [1/2] (short) (narrow) %v1155_v60, %v1154_v59, 16 }
 0x167   : > { %3248 = vxpose.binary.xlu1.c.b16.start.end [1/2] (short) (narrow) %v1153_v61, %v1152_v62, 16 }
 0x168   : > { %s4218_s26 = scalar_lea.vmem %s4217_s3, %s3623_s0 }
 0x16b   : > { %v1004_v57 = vpop.f32.mrf.mxu2 }
 0x175   : > { %3251 = vxpose.binary.xlu2.c.b16.start.end [1/2] (short) (narrow) %v1149_v4, %v1148_v3, 16 }
 0x1de   : > { %1163 = vrot.lane.b32.xlu2 %v3794_v53, %s3437_s28  ;;  %s4215_s28 = sld [smem:[#allocation29_spill]] }
 0x1e6   : > { %1160 = vrot.lane.b32.xlu2 %v3794_v53, %s3436_s24 }
 0x206   : > { %v3246_v7 = vpop.trf.xlu2 }
 0x207   : > { %v1418_v11 = vrot.slane %v3246_v7, 4 }
 0x20e   : > { %v3247_v9 = vpop.trf.xlu2 }
 0x20f   : > { %v3255_v8 = vpop.trf.xlu0  ;;  %v1446_v17 = vrot.slane %v3247_v9, 4 }
 0x210   : > { %v1419_v14 = vsel %vm1018_vm2, %v1418_v11, %v3255_v8  ;;  %v3244_v11 = vunpack.i.h.bf16 %v3743_v29 }
 0x211   : > { %v1423_v19 = vperm.slane %v1419_v14, %v3739_v24  ;;  %v1017_v14 = vrot.slane %v3769_v5, 4 }
 0x213   : > { %v3249_v10 = vpop.trf.xlu1  ;;  %v1424_v25 = vrot.slane %v1423_v19, 4 }
 0x214   : > { %v1412_v12 = vrot.slane %v3249_v10, 4 }
 0x216   : > { %v3252_v15 = vpop.trf.xlu2 }
 0x217   : > { %v3256_v16 = vpop.trf.xlu0  ;;  %v1413_v18 = vsel %vm1018_vm2, %v1412_v12, %v3252_v15  ;;  %v1020_v12 = vrot.slane %v3728_v13, 4 }
 0x218   : > { %v1447_v20 = vsel %vm1018_vm2, %v1446_v17, %v3256_v16  ;;  %v1417_v21 = vperm.slane %v1413_v18, %v3739_v24  ;;  %v1032_v16 = vrot.slane %v3244_v11, 4  ;;  %v1030_v18 = vrot.slane %v3771_v6, 4 }
 0x219   : > { %v1451_v26 = vperm.slane %v1447_v20, %v3739_v24  ;;  %v1021_v15 = vsel %vm1018_vm2, %v3769_v5, %v1020_v12 }
 0x21a   : > { %v1425_v27 = vsel %vm1018_vm2, %v1424_v25, %v1417_v21  ;;  %v1426_v42 = vrot.slane %v1417_v21, 4  ;;  %v1029_v20 = vperm.slane %v1021_v15, %v3739_v24  ;;  %v1019_v21 = vsel %vm1018_vm2, %v1017_v14, %v3728_v13 }
 0x21b   : > { %v3250_v22 = vpop.trf.xlu1  ;;  %v1452_v31 = vrot.slane %v1451_v26, 4  ;;  %v1431_v33 = vperm.slane %v1425_v27, %v3748_v35 }
 0x21c   : > { %v1440_v23 = vrot.slane %v3250_v22, 4  ;;  %v1427_v44 = vsel %vm1018_vm2, %v1423_v19, %v1426_v42  ;;  %v1033_v19 = vsel %vm1018_vm2, %v3771_v6, %v1032_v16  ;;  %v1031_v22 = vsel %vm1018_vm2, %v1030_v18, %v3244_v11 }
 0x21d   : > { %v1472_v37 = vshrl.u32 %v1431_v33, 16  ;;  %v1435_v46 = vperm.slane %v1427_v44, %v3748_v35  ;;  %v1436_v55 = vrot.slane %v1431_v33, 4  ;;  %v1041_v29 = vperm.slane %v1033_v19, %v3739_v24 }
 0x21e   : > { %v3253_v28 = vpop.trf.xlu2  ;;  %v1056_v25 = vrot.slane %v1029_v20, 4 }
 0x21f   : > { %v1441_v30 = vsel %vm1018_vm2, %v1440_v23, %v3253_v28  ;;  %v1488_v48 = vshrl.u32 %v1435_v46, 16  ;;  %v1437_v58 = vsel %vm1018_vm2, 0, %v1436_v55  ;;  %v1438_v0 = vrot.slane %v1435_v46, 4 }
 0x220   : > { %v1445_v32 = vperm.slane %v1441_v30, %v3739_v24  ;;  %v1480_v60 = vshrl.u32 %v1437_v58, 16  ;;  %v1025_v23 = vperm.slane %v1019_v21, %v3739_v24  ;;  %v1054_v27 = vrot.slane %v1041_v29, 4 }
 0x221   : > { %v1439_v2 = vsel %vm1018_vm2, 0, %v1438_v0  ;;  %v1057_v28 = vsel %vm1018_vm2, %v1041_v29, %v1056_v25 }
 0x222   : > { %v1453_v34 = vsel %vm1018_vm2, %v1452_v31, %v1445_v32  ;;  %v1454_v41 = vrot.slane %v1445_v32, 4  ;;  %v1496_v4 = vshrl.u32 %v1439_v2, 16  ;;  %v1044_v30 = vrot.slane %v1025_v23, 4 }
 0x223   : > { %v1459_v36 = vperm.slane %v1453_v34, %v3748_v35  ;;  %v1065_v6 = vperm.slane %v1057_v28, %v3748_v35  ;;  %v1055_v13 = vsel %vm1018_vm2, %v1054_v27, %v1029_v20 }
 0x224   : > { %v1455_v43 = vsel %vm1018_vm2, %v1451_v26, %v1454_v41  ;;  %v1037_v26 = vperm.slane %v1031_v22, %v3739_v24  ;;  %v1061_v34 = vperm.slane %v1055_v13, %v3748_v35 }
 0x225   : > { %v1473_v38 = vshrl.u32 %v1459_v36, 16  ;;  %v1470_v39 = vpack.i.b16 %v1459_v36, %v1431_v33  ;;  %v1463_v45 = vperm.slane %v1455_v43, %v3748_v35  ;;  %v1464_v54 = vrot.slane %v1459_v36, 4 }
 0x226   : > { %v1042_v31 = vrot.slane %v1037_v26, 4  ;;  %v1045_v32 = vsel %vm1018_vm2, %v1037_v26, %v1044_v30  ;;  %v1072_v36 = vrot.slane %v1065_v6, 4  ;;  %v1070_v41 = vrot.slane %v1061_v34, 4 }
 0x227   : > { %v1474_v40 = vpack.i.b16 %v1473_v38, %v1472_v37  ;;  %v1489_v47 = vshrl.u32 %v1463_v45, 16  ;;  %v1486_v49 = vpack.i.b16 %v1463_v45, %v1435_v46  ;;  %v1465_v56 = vsel %vm1018_vm2, 0, %v1464_v54 }
 0x228   : > { %v1481_v59 = vshrl.u32 %v1465_v56, 16  ;;  %v1478_v61 = vpack.i.b16 %v1465_v56, %v1437_v58  ;;  %v1466_v63 = vrot.slane %v1463_v45, 4  ;;  %v1053_v33 = vperm.slane %v1045_v32, %v3748_v35 }
 0x229   : > { %3257 = vxpose.binary.xlu1.c.b16.start.end [1/2] (short) (narrow) %v1474_v40, %v1470_v39, 16  ;;  %v1490_v50 = vpack.i.b16 %v1489_v47, %v1488_v48  ;;  %v1043_v38 = vsel %vm1018_vm2, %v1042_v31, %v1025_v23  ;;  %v1073_v42 = vsel %vm1018_vm2, 0.0, %v1072_v36  ;;  %v1071_v46 = vsel %vm1018_vm2, 0.0, %v1070_v41 }
 0x22a   : > { %v1482_v62 = vpack.i.b16 %v1481_v59, %v1480_v60  ;;  %v1467_v1 = vsel %vm1018_vm2, 0, %v1466_v63  ;;  %v1049_v39 = vperm.slane %v1043_v38, %v3748_v35  ;;  %v1068_v40 = vrot.slane %v1053_v33, 4 }
 0x22b   : > { %v1497_v3 = vshrl.u32 %v1467_v1, 16  ;;  %v1494_v7 = vpack.i.b16 %v1467_v1, %v1439_v2  ;;  %v1081_v43 = vpack.c.bf16 %v1073_v42, %v1073_v42  ;;  %v1080_v47 = vpack.c.bf16 %v1065_v6, %v1065_v6 }
 0x22c   : > { %v1066_v44 = vrot.slane %v1049_v39, 4  ;;  %v1069_v45 = vsel %vm1018_vm2, 0.0, %v1068_v40  ;;  %v1076_v54 = vpack.c.bf16 %v1053_v33, %v1053_v33  ;;  %v1078_v55 = vpack.c.bf16 %v1061_v34, %v1061_v34 }
 0x22d   : > { %v1498_v8 = vpack.i.b16 %v1497_v3, %v1496_v4  ;;  %v1258_v51 = vrot.slane %v1081_v43, 4  ;;  %v1238_v56 = vrot.slane %v1080_v47, 4 }
 0x22e   : > { %v1067_v52 = vsel %vm1018_vm2, 0.0, %v1066_v44 }
 0x22f   : > { %v1075_v57 = vpack.c.bf16 %v1067_v52, %v1067_v52  ;;  %v1239_v63 = vsel %vm1018_vm2, %v1238_v56, %v1076_v54  ;;  %v1168_v56 = vrot.slane %v3794_v53, 4 }
 0x238   : > { %v1164_v13 = vpop.permute.xlu2 %1163 }
 0x239   : > { %3260 = vxpose.binary.xlu1.c.b16.start.end [1/2] (short) (narrow) %v1490_v50, %v1486_v49, 16  ;;  %v1077_v49 = vpack.c.bf16 %v1069_v45, %v1069_v45  ;;  %v1079_v50 = vpack.c.bf16 %v1071_v46, %v1071_v46 }
 0x23b   : > { %v1252_v58 = vrot.slane %v1079_v50, 4  ;;  %v1259_v60 = vsel %vm1018_vm2, %v1258_v51, %v1077_v49 }
 0x23c   : > { %v1263_v2 = vperm.slane %v1259_v60, %v3739_v24 }
 0x249   : > { %3263 = vxpose.binary.xlu1.c.b16.start.end [1/2] (short) (narrow) %v1482_v62, %v1478_v61, 16  ;;  %v1074_v61 = vpack.c.bf16 %v1049_v39, %v1049_v39  ;;  %v1231_v62 = vrot.slane %v1078_v55, 4 }
 0x24b   : > { %v1233_v12 = vsel %vm1018_vm2, %v1231_v62, %v1074_v61 }
 0x24c   : > { %v1237_v19 = vperm.slane %v1233_v12, %v3739_v24 }
 0x259   : > { %3266 = vxpose.binary.xlu1.c.b16.start.end [1/2] (short) (narrow) %v1498_v8, %v1494_v7, 16  ;;  %v1243_v7 = vperm.slane %v1239_v63, %v3739_v24  ;;  %v1253_v8 = vsel %vm1018_vm2, %v1252_v58, %v1075_v57  ;;  %v1161_v57 = vpop.permute.xlu2 %1160 }
 0x25a   : > { %v1257_v16 = vperm.slane %v1253_v8, %v3739_v24  ;;  %v1166_v62 = vrot.slane %v1161_v57, 4  ;;  %v1169_v63 = vsel %vm1018_vm2, %v1161_v57, %v1168_v56 }
 0x2b3   : > { %1157 = vrot.lane.b32.xlu1 %v3794_v53, %s3438_s21  ;;  %s4216_s21 = scalar_lea.vmem %s4215_s28, %s3623_s0 }
 0x2d5   : > { %v3258_v9 = vpop.trf.xlu1 }
 0x2dd   : > { %v3806_v10 = vpop.trf.xlu1 }
 0x2e5   : > { %v3261_v17 = vpop.trf.xlu1 }
 0x2e6   : > { %v1628_v59 = vrot.slane %v3261_v17, 4  ;;  %v1264_v17 = vrot.slane %v1263_v2, 4 }
 0x2e8   : > { %v1629_v3 = vsel %vm1018_vm2, %v1628_v59, %v3258_v9  ;;  %v1244_v9 = vrot.slane %v1243_v7, 4  ;;  %v1265_v22 = vsel %vm1018_vm2, %v1264_v17, %v1257_v16 }
 0x2e9   : > { %v1633_v14 = vperm.slane %v1629_v3, %v3739_v24  ;;  %v3856_v28 = vperm.slane %v1265_v22, %v3748_v35  ;;  %v1167_v3 = vsel %vm1018_vm2, %v1166_v62, %v3794_v53 }
 0x2ea   : > { %v1245_v27 = vsel %vm1018_vm2, %v1244_v9, %v1237_v19 }
 0x2eb   : > { %v1249_v31 = vperm.slane %v1245_v27, %v3748_v35  ;;  %v1270_v34 = vrot.slane %v3856_v28, 4  ;;  %v1276_v12 = vshrl.u32 %v3856_v28, 16 }
 0x2ed   : > { %v3262_v5 = vpop.trf.xlu1  ;;  %v1271_v45 = vsel %vm1018_vm2, 0, %v1270_v34  ;;  %v1274_v50 = vpack.i.b16 %v3856_v28, %v1249_v31  ;;  %v1230_v34 = vld [vmem:[%s4208_s29] sm:$0xff] }
 0x2ee   : > { %v1648_v18 = vrot.slane %v3262_v5, 4  ;;  %v1282_v55 = vshrl.u32 %v1271_v45, 16 }
 0x2f0   : > { %v1649_v23 = vsel %vm1018_vm2, %v1648_v18, %v3806_v10  ;;  %v1275_v18 = vshrl.u32 %v1249_v31, 16 }
 0x2f1   : > { %v1653_v30 = vperm.slane %v1649_v23, %v3739_v24 }
 0x2f5   : > { %v3264_v37 = vpop.trf.xlu1 }
 0x2fd   : > { %v3265_v48 = vpop.trf.xlu1 }
 0x305   : > { %v3267_v0 = vpop.trf.xlu1 }
 0x306   : > { %v1634_v1 = vrot.slane %v3267_v0, 4  ;;  %v1178_v0 = vrot.slane %v1164_v13, 4 }
 0x308   : > { %v1635_v4 = vsel %vm1018_vm2, %v1634_v1, %v3264_v37  ;;  %v1250_v37 = vrot.slane %v1249_v31, 4  ;;  %v1177_v1 = vperm.slane %v1169_v63, %v3739_v24 }
 0x309   : > { %v1639_v11 = vperm.slane %v1635_v4, %v3739_v24 }
 0x30a   : > { %v1251_v51 = vsel %vm1018_vm2, 0, %v1250_v37 }
 0x30b   : > { %v1640_v15 = vrot.slane %v1639_v11, 4  ;;  %v1280_v59 = vpack.i.b16 %v1271_v45, %v1251_v51  ;;  %v1281_v60 = vshrl.u32 %v1251_v51, 16 }
 0x30d   : > { %v3268_v20 = vpop.trf.xlu1  ;;  %v1641_v21 = vsel %vm1018_vm2, %v1640_v15, %v1633_v14  ;;  %v1283_v61 = vpack.i.b16 %v1282_v55, %v1281_v60  ;;  %v1173_v14 = vperm.slane %v1167_v3, %v3739_v24  ;;  %v1204_v15 = vrot.slane %v1177_v1, 4 }
 0x30e   : > { %v1654_v29 = vrot.slane %v3268_v20, 4  ;;  %v1645_v26 = vperm.slane %v1641_v21, %v3748_v35  ;;  %v1277_v20 = vpack.i.b16 %v1276_v12, %v1275_v18 }
 0x310   : > { %v1655_v25 = vsel %vm1018_vm2, %v1654_v29, %v3265_v48  ;;  %v1646_v32 = vrot.slane %v1645_v26, 4  ;;  %v1671_v36 = vshrl.u32 %v1645_v26, 16 }
 0x311   : > { %v1659_v5 = vperm.slane %v1655_v25, %v3739_v24 }
 0x312   : > { %v1647_v40 = vsel %vm1018_vm2, 0, %v1646_v32 }
 0x313   : > { %v1660_v6 = vrot.slane %v1659_v5, 4  ;;  %v1677_v47 = vshrl.u32 %v1647_v40, 16 }
 0x315   : > { %v1661_v10 = vsel %vm1018_vm2, %v1660_v6, %v1653_v30 }
 0x316   : > { %v1665_v33 = vperm.slane %v1661_v10, %v3748_v35 }
 0x318   : > { %v1670_v38 = vpack.i.b16 %v1665_v33, %v1645_v26  ;;  %v1672_v39 = vshrl.u32 %v1665_v33, 16  ;;  %v1666_v41 = vrot.slane %v1665_v33, 4 }
 0x31a   : > { %v1686_v42 = vsel %vm1684_vm3, %v1670_v38, 0  ;;  %v1673_v43 = vpack.i.b16 %v1672_v39, %v1671_v36  ;;  %v1667_v44 = vsel %vm1018_vm2, 0, %v1666_v41 }
 0x31b   : > { %1695 = vmatpush.bf16.msra.mxu3 %v1686_v42  ;;  %v1676_v46 = vpack.i.b16 %v1667_v44, %v1647_v40  ;;  %v1678_v48 = vshrl.u32 %v1667_v44, 16 }
 0x31c   : > { %v1705_v49 = vsel %vm1684_vm3, %v1673_v43, 0 }
 0x31d   : > { %v1724_v52 = vsel %vm1684_vm3, %v1676_v46, 0  ;;  %v1679_v54 = vpack.i.b16 %v1678_v48, %v1677_v47 }
 0x31e   : > { %3091 = vmatmul.msk.bf16.vlgmr.msra.gmra.mxu3 %vm1680_vm4, %v1274_v50  ;;  %1733 = vmatpush.bf16.msrb.mxu0 %v1724_v52  ;;  %v1192_v52 = vrot.slane %v1173_v14, 4 }
 0x31f   : > { %1714 = vmatpush.bf16.msrb.mxu3 %v1705_v49  ;;  %v1743_v58 = vsel %vm1684_vm3, %v1679_v54, 0 }
 0x320   : > { %1752 = vmatpush.bf16.msrb.mxu1 %v1743_v58 }
 0x321   : > { %3093 = vmatmul.msk.bf16.vlgmr.msrb.gmra.mxu0 %vm1680_vm4, %v1280_v59 }
 0x323   : > { %3094 = vmatmul.msk.bf16.vlgmr.msrb.gmra.mxu1 %vm1680_vm4, %v1283_v61 }
 0x325   : > { %v1158_v2 = vpop.permute.xlu1 %1157 }
 0x326   : > { %v1179_v4 = vsel %vm1018_vm2, %v1178_v0, %v1158_v2  ;;  %v1180_v7 = vrot.slane %v1158_v2, 4 }
 0x327   : > { %v1185_v8 = vperm.slane %v1179_v4, %v3739_v24 }
 0x328   : > { %v1181_v11 = vsel %vm1018_vm2, %v1164_v13, %v1180_v7 }
 0x329   : > { %v1189_v16 = vperm.slane %v1181_v11, %v3739_v24  ;;  %v1190_v17 = vrot.slane %v1185_v8, 4  ;;  %v1193_v54 = vsel %vm1018_vm2, %v1185_v8, %v1192_v52 }
 0x32a   : > { %v1201_v55 = vperm.slane %v1193_v54, %v3748_v35 }
 0x32b   : > { %v1191_v19 = vsel %vm1018_vm2, %v1190_v17, %v1173_v14  ;;  %v1202_v9 = vrot.slane %v1189_v16, 4  ;;  %v1205_v53 = vsel %vm1018_vm2, %v1189_v16, %v1204_v15 }
 0x32c   : > { %v1213_v21 = vperm.slane %v1205_v53, %v3748_v35  ;;  %v1197_v29 = vperm.slane %v1191_v19, %v3748_v35  ;;  %v1216_v56 = vrot.slane %v1201_v55, 4  ;;  %v1224_v58 = vpack.c.bf16 %v1201_v55, %v1201_v55 }
 0x32d   : > { %v1203_v22 = vsel %vm1018_vm2, %v1202_v9, %v1177_v1 }
 0x32e   : > { %3092 = vmatmul.msk.bf16.vlgmr.msrb.gmra.mxu3 %vm1680_vm4, %v1277_v20  ;;  %v1220_v23 = vrot.slane %v1213_v21, 4  ;;  %v1214_v25 = vrot.slane %v1197_v29, 4  ;;  %v1209_v26 = vperm.slane %v1203_v22, %v3748_v35  ;;  %v1228_v28 = vpack.c.bf16 %v1213_v21, %v1213_v21 }
 0x32f   : > { %v1222_v32 = vpack.c.bf16 %v1197_v29, %v1197_v29  ;;  %v1217_v57 = vsel %vm1018_vm2, 0.0, %v1216_v56 }
 0x330   : > { %v1221_v27 = vsel %vm1018_vm2, 0.0, %v1220_v23  ;;  %v1215_v5 = vsel %vm1018_vm2, 0.0, %v1214_v25  ;;  %v1218_v31 = vrot.slane %v1209_v26, 4  ;;  %v1226_v10 = vpack.c.bf16 %v1209_v26, %v1209_v26 }
 0x331   : > { %v1229_v30 = vpack.c.bf16 %v1221_v27, %v1221_v27  ;;  %v1223_v6 = vpack.c.bf16 %v1215_v5, %v1215_v5  ;;  %v1225_v59 = vpack.c.bf16 %v1217_v57, %v1217_v57 }
 0x332   : > { %v1219_v13 = vsel %vm1018_vm2, 0.0, %v1218_v31 }
 0x333   : > { %3275 = vxpose.binary.xlu1.c.b16.start.end [1/2] (short) (narrow) %v1229_v30, %v1228_v28, 16  ;;  %v1227_v33 = vpack.c.bf16 %v1219_v13, %v1219_v13 }
 0x334   : > { %3272 = vxpose.binary.xlu2.c.b16.start.end [1/2] (short) (narrow) %v1223_v6, %v1222_v32, 16 }
 0x335   : > { %3269 = vxpose.binary.xlu0.c.b16.start.end [1/2] (short) (narrow) %v1227_v33, %v1226_v10, 16 }
 0x39e   : > { %v1735_v36 = vpop.f32.mrf.mxu0 }
 0x39f   : > { %v1736_v37 = vadd.f32 %v1735_v36, %v1230_v34 }
 0x3a0   : > { %v1754_v38 = vpop.f32.mrf.mxu1 }
 0x3a1   : > { %v1697_v39 = vpop.f32.mrf.mxu3  ;;  %v1764_v40 = vsel %vm1680_vm4, %v1736_v37, -inf  ;;  %v3900_v42 = vadd.f32 %v1754_v38, %v1230_v34 }
 0x3a2   : > { %v3904_v46 = vadd.f32 %v1697_v39, %v1230_v34 }
 0x3a3   : > { %v1767_v45 = vsel %vm1680_vm4, %v3900_v42, -inf }
 0x3a4   : > { %v1758_v49 = vsel %vm1680_vm4, %v3904_v46, -inf }
 0x3a5   : > { %1765 = vmax.xlane.f32.xlu2 %v1764_v40 }
 0x3a6   : > { %v1737_v41 = vpop.f32.mrf.mxu0 }
 0x3a8   : > { %v1756_v43 = vpop.f32.mrf.mxu1 }
 0x3a9   : > { %v1699_v44 = vpop.f32.mrf.mxu3 }
 0x3ad   : > { %1768 = vmax.xlane.f32.xlu2 %v1767_v45 }
 0x3b1   : > { %v1716_v47 = vpop.f32.mrf.mxu3 }
 0x3b2   : > { %v1717_v48 = vadd.f32 %v1716_v47, %v1230_v34 }
 0x3b4   : > { %v1761_v50 = vsel %vm1680_vm4, %v1717_v48, -inf }
 0x3b5   : > { %1759 = vmax.xlane.f32.xlu2 %v1758_v49  ;;  %1762 = vmax.xlane.f32.xlu0 %v1761_v50 }
 0x3b9   : > { %v1718_v51 = vpop.f32.mrf.mxu3 }
 0x3d5   : > { %v3273_v60 = vpop.trf.xlu2 }
 0x3dd   : > { %v3274_v2 = vpop.trf.xlu2 }
 0x3de   : > { %3278 = vxpose.binary.xlu0.c.b16.start.end [1/2] (short) (narrow) %v1225_v59, %v1224_v58, 16 }
 0x3df   : > { %v3276_v19 = vpop.trf.xlu1 }
 0x3e0   : > { %v1944_v9 = vrot.slane %v3276_v19, 4 }
 0x3e1   : > { %v3270_v61 = vpop.trf.xlu0 }
 0x3e2   : > { %v1938_v62 = vrot.slane %v3270_v61, 4 }
 0x3e4   : > { %v1939_v63 = vsel %vm1018_vm2, %v1938_v62, %v3273_v60 }
 0x3e5   : > { %v1943_v53 = vperm.slane %v1939_v63, %v3739_v24 }
 0x3e7   : > { %v1952_v29 = vrot.slane %v1943_v53, 4  ;;  %v3277_v23 = vpop.trf.xlu1 }
 0x3e8   : > { %v1972_v27 = vrot.slane %v3277_v23, 4 }
 0x3e9   : > { %v3271_v0 = vpop.trf.xlu0 }
 0x3ea   : > { %v1966_v1 = vrot.slane %v3271_v0, 4 }
 0x3ec   : > { %v1967_v3 = vsel %vm1018_vm2, %v1966_v1, %v3274_v2 }
 0x3ed   : > { %v1971_v5 = vperm.slane %v1967_v3, %v3739_v24 }
 0x3ef   : > { %v1980_v13 = vrot.slane %v1971_v5, 4 }
 0x418   : > { %v1766_v4 = vpop.xlane.xlu2 %1765 }
 0x419   : > { %v1772_v7 = vsub.f32 %v1736_v37, %v1766_v4 }
 0x41b   : > { %v1778_v8 = vmul.f32 1.442695, %v1772_v7 }
 0x41d   : > { %3317 = vpow2.f32 %v1778_v8 }
 0x423   : > { %v3318_v11 = vpop.eup %3317 }
 0x424   : > { %v1788_v12 = vsel %vm1680_vm4, %v3318_v11, 0.0 }
 0x425   : > { %1789 = vadd.xlane.f32.xlu1 %v1788_v12 }
 0x428   : > { %v1763_v14 = vpop.xlane.xlu0 %1762 }
 0x429   : > { %v1771_v15 = vsub.f32 %v1717_v48, %v1763_v14 }
 0x42b   : > { %v1776_v16 = vmul.f32 1.442695, %v1771_v15 }
 0x42d   : > { %3319 = vpow2.f32 %v1776_v16 }
 0x433   : > { %v3915_v17 = vpop.eup %3319 }
 0x434   : > { %v1785_v18 = vsel %vm1680_vm4, %v3915_v17, 0.0 }
 0x44f   : > { %1786 = vadd.xlane.f32.xlu0 %v1785_v18 }
 0x48a   : > { %v3279_v20 = vpop.trf.xlu0 }
 0x48b   : > { %v1945_v21 = vsel %vm1018_vm2, %v1944_v9, %v3279_v20 }
 0x48c   : > { %v1949_v22 = vperm.slane %v1945_v21, %v3739_v24 }
 0x48e   : > { %v1950_v25 = vrot.slane %v1949_v22, 4  ;;  %v1953_v26 = vsel %vm1018_vm2, %v1949_v22, %v1952_v29 }
 0x48f   : > { %v1961_v30 = vperm.slane %v1953_v26, %v3748_v35 }
 0x490   : > { %v1951_v28 = vsel %vm1018_vm2, %v1950_v25, %v1943_v53 }
 0x491   : > { %v3927_v6 = vperm.slane %v1951_v28, %v3748_v35  ;;  %v1964_v33 = vrot.slane %v1961_v30, 4  ;;  %v2014_v41 = vshrl.u32 %v1961_v30, 16 }
 0x492   : > { %v3280_v31 = vpop.trf.xlu0 }
 0x493   : > { %v1973_v32 = vsel %vm1018_vm2, %v1972_v27, %v3280_v31  ;;  %v1962_v37 = vrot.slane %v3927_v6, 4  ;;  %v1965_v43 = vsel %vm1018_vm2, 0, %v1964_v33  ;;  %v1998_v50 = vshrl.u32 %v3927_v6, 16 }
 0x494   : > { %v1977_v10 = vperm.slane %v1973_v32, %v3739_v24  ;;  %v2022_v57 = vshrl.u32 %v1965_v43, 16 }
 0x495   : > { %v1963_v49 = vsel %vm1018_vm2, 0, %v1962_v37 }
 0x496   : > { %v1978_v34 = vrot.slane %v1977_v10, 4  ;;  %v1981_v36 = vsel %vm1018_vm2, %v1977_v10, %v1980_v13  ;;  %v2006_v63 = vshrl.u32 %v1963_v49, 16 }
 0x497   : > { %v1989_v38 = vperm.slane %v1981_v36, %v3748_v35 }
 0x498   : > { %v1979_v39 = vsel %vm1018_vm2, %v1978_v34, %v1971_v5  ;;  %v1790_v40 = vpop.xlane.xlu1 %1789 }
 0x499   : > { %v1985_v44 = vperm.slane %v1979_v39, %v3748_v35  ;;  %3321 = vrcp.f32 %v1790_v40  ;;  %v2012_v45 = vpack.i.b16 %v1989_v38, %v1961_v30  ;;  %v2015_v47 = vshrl.u32 %v1989_v38, 16 }
 0x49a   : > { %v1992_v48 = vrot.slane %v1989_v38, 4 }
 0x49b   : > { %v2016_v51 = vpack.i.b16 %v2015_v47, %v2014_v41  ;;  %v1990_v52 = vrot.slane %v1985_v44, 4  ;;  %v1996_v54 = vpack.i.b16 %v1985_v44, %v3927_v6  ;;  %v1999_v55 = vshrl.u32 %v1985_v44, 16 }
 0x49c   : > { %v1993_v56 = vsel %vm1018_vm2, 0, %v1992_v48 }
 0x49d   : > { %3287 = vxpose.binary.xlu0.c.b16.start.end [1/2] (short) (narrow) %v2016_v51, %v2012_v45, 16  ;;  %v2020_v58 = vpack.i.b16 %v1993_v56, %v1965_v43  ;;  %v2023_v59 = vshrl.u32 %v1993_v56, 16  ;;  %v1991_v60 = vsel %vm1018_vm2, 0, %v1990_v52  ;;  %v2000_v61 = vpack.i.b16 %v1999_v55, %v1998_v50 }
 0x49e   : > { %v2004_v62 = vpack.i.b16 %v1991_v60, %v1963_v49  ;;  %v2007_v0 = vshrl.u32 %v1991_v60, 16 }
 0x49f   : > { %v3322_v1 = vpop.eup %3321  ;;  %v2024_v2 = vpack.i.b16 %v2023_v59, %v2022_v57 }
 0x4a0   : > { %v2008_v3 = vpack.i.b16 %v2007_v0, %v2006_v63  ;;  %v1800_v4 = vmul.f32 %v3322_v1, %v3318_v11  ;;  %v1769_v11 = vpop.xlane.xlu2 %1768 }
 0x4a1   : > { %3281 = vxpose.binary.xlu1.c.b16.start.end [1/2] (short) (narrow) %v2024_v2, %v2020_v58, 16  ;;  %v1773_v19 = vsub.f32 %v3900_v42, %v1769_v11 }
 0x4a2   : > { %3284 = vxpose.binary.xlu2.c.b16.start.end [1/2] (short) (narrow) %v2008_v3, %v2004_v62, 16  ;;  %1804 = vst.msk [vmem:[%s3702_s2 + $0x10] sm:$0xff] %vm1680_vm4, %v1800_v4  ;;  %v1808_v7 = vpack.c.bf16 %v1800_v4, %v1800_v4 }
 0x4a3   : > { %v1780_v9 = vmul.f32 1.442695, %v1773_v19 }
 0x4a4   : > { %v2248_v8 = vsel %vm1680_vm4, %v1808_v7, 0 }
 0x4a5   : > { %2257 = vmatpush.bf16.xpose.msra.mxu0 %v2248_v8 }
 0x4a8   : > { %v1760_v53 = vpop.xlane.xlu2 %1759 }
 0x4a9   : > { %v1770_v20 = vsub.f32 %v3904_v46, %v1760_v53 }
 0x4ab   : > { %v1774_v21 = vmul.f32 1.442695, %v1770_v20 }
 0x4c2   : > { %v1787_v12 = vpop.xlane.xlu0 %1786 }
 0x4c3   : > { %3323 = vrcp.f32 %v1787_v12 }
 0x4c4   : > { %3325 = vpow2.f32 %v1780_v9 }
 0x4c5   : > { %3327 = vpow2.f32 %v1774_v21 }
 0x4c9   : > { %v3324_v14 = vpop.eup %3323 }
 0x4ca   : > { %v1799_v15 = vmul.f32 %v3324_v14, %v3915_v17  ;;  %v3326_v29 = vpop.eup %3325 }
 0x4cb   : > { %v1791_v17 = vsel %vm1680_vm4, %v3326_v29, 0.0  ;;  %v3328_v22 = vpop.eup %3327 }
 0x4cc   : > { %1803 = vst.msk [vmem:[%s3702_s2 + $0x8] sm:$0xff] %vm1680_vm4, %v1799_v15  ;;  %v1807_v16 = vpack.c.bf16 %v1799_v15, %v1799_v15  ;;  %v1782_v23 = vsel %vm1680_vm4, %v3328_v22, 0.0 }
 0x4ce   : > { %v2229_v18 = vsel %vm1680_vm4, %v1807_v16, 0 }
 0x4cf   : > { %2238 = vmatpush.bf16.xpose.msra.mxu3 %v2229_v18 }
 0x513   : > { %1792 = vadd.xlane.f32.xlu2 %v1791_v17 }
 0x51b   : > { %1783 = vadd.xlane.f32.xlu2 %v1782_v23 }
 0x543   : > { %v3285_v25 = vpop.trf.xlu2 }
 0x544   : > { %3290 = vxpose.binary.xlu2.c.b16.start.end [1/2] (short) (narrow) %v2000_v61, %v1996_v54, 16 }
 0x549   : > { %v3288_v34 = vpop.trf.xlu0 }
 0x54a   : > { %v2154_v38 = vrot.slane %v3288_v34, 4 }
 0x54b   : > { %v3286_v42 = vpop.trf.xlu2 }
 0x54d   : > { %v3282_v10 = vpop.trf.xlu1 }
 0x54e   : > { %v2160_v33 = vrot.slane %v3282_v10, 4 }
 0x550   : > { %v2161_v36 = vsel %vm1018_vm2, %v2160_v33, %v3285_v25 }
 0x551   : > { %v2165_v39 = vperm.slane %v2161_v36, %v3739_v24  ;;  %v3289_v47 = vpop.trf.xlu0 }
 0x552   : > { %v2174_v50 = vrot.slane %v3289_v47, 4 }
 0x553   : > { %v2166_v44 = vrot.slane %v2165_v39, 4 }
 0x555   : > { %v3283_v37 = vpop.trf.xlu1 }
 0x556   : > { %v2180_v40 = vrot.slane %v3283_v37, 4 }
 0x558   : > { %v2181_v48 = vsel %vm1018_vm2, %v2180_v40, %v3286_v42 }
 0x559   : > { %v2185_v51 = vperm.slane %v2181_v48, %v3739_v24 }
 0x55b   : > { %v2186_v56 = vrot.slane %v2185_v51, 4 }
 0x586   : > { %v1793_v26 = vpop.xlane.xlu2 %1792 }
 0x587   : > { %3329 = vrcp.f32 %v1793_v26 }
 0x58d   : > { %v3330_v27 = vpop.eup %3329 }
 0x58e   : > { %v1784_v5 = vpop.xlane.xlu2 %1783  ;;  %v1801_v46 = vmul.f32 %v3330_v27, %v3326_v29 }
 0x58f   : > { %3331 = vrcp.f32 %v1784_v5 }
 0x590   : > { %1805 = vst.msk [vmem:[%s3702_s2 + $0x18] sm:$0xff] %vm1680_vm4, %v1801_v46  ;;  %v1809_v28 = vpack.c.bf16 %v1801_v46, %v1801_v46 }
 0x592   : > { %v2267_v30 = vsel %vm1680_vm4, %v1809_v28, 0 }
 0x593   : > { %2276 = vmatpush.bf16.xpose.msra.mxu1 %v2267_v30 }
 0x595   : > { %v3332_v6 = vpop.eup %3331 }
 0x596   : > { %v1798_v31 = vmul.f32 %v3332_v6, %v3328_v22 }
 0x598   : > { %1802 = vst.msk [vmem:[%s3702_s2] sm:$0xff] %vm1680_vm4, %v1798_v31  ;;  %v1806_v32 = vpack.c.bf16 %v1798_v31, %v1798_v31 }
 0x59a   : > { %v2210_v13 = vsel %vm1680_vm4, %v1806_v32, 0 }
 0x59b   : > { %2219 = vmatpush.bf16.xpose.msrb.mxu2 %v2210_v13 }
 0x5e5   : > { %v3291_v41 = vpop.trf.xlu2 }
 0x5e6   : > { %v2155_v43 = vsel %vm1018_vm2, %v2154_v38, %v3291_v41 }
 0x5e7   : > { %v2159_v45 = vperm.slane %v2155_v43, %v3739_v24 }
 0x5e9   : > { %v2167_v49 = vsel %vm1018_vm2, %v2166_v44, %v2159_v45 }
 0x5ea   : > { %v2171_v52 = vperm.slane %v2167_v49, %v3748_v35 }
 0x5ec   : > { %v2172_v58 = vrot.slane %v2171_v52, 4  ;;  %v2197_v61 = vshrl.u32 %v2171_v52, 16 }
 0x5ed   : > { %v3292_v54 = vpop.trf.xlu2 }
 0x5ee   : > { %v2175_v55 = vsel %vm1018_vm2, %v2174_v50, %v3292_v54  ;;  %v2173_v1 = vsel %vm1018_vm2, 0, %v2172_v58 }
 0x5ef   : > { %v2179_v57 = vperm.slane %v2175_v55, %v3739_v24  ;;  %v2203_v7 = vshrl.u32 %v2173_v1, 16 }
 0x5f1   : > { %v2187_v59 = vsel %vm1018_vm2, %v2186_v56, %v2179_v57 }
 0x5f2   : > { %v2191_v60 = vperm.slane %v2187_v59, %v3748_v35 }
 0x5f4   : > { %v2192_v62 = vrot.slane %v2191_v60, 4  ;;  %v2198_v63 = vshrl.u32 %v2191_v60, 16  ;;  %v2196_v0 = vpack.i.b16 %v2191_v60, %v2171_v52 }
 0x5f6   : > { %3095 = vmatmul.msk.bf16.vlgmr.msrb.gmra.mxu2 %vm1680_vm4, %v2196_v0  ;;  %v2199_v2 = vpack.i.b16 %v2198_v63, %v2197_v61  ;;  %v2193_v3 = vsel %vm1018_vm2, 0, %v2192_v62 }
 0x5f7   : > { %v2202_v4 = vpack.i.b16 %v2193_v3, %v2173_v1  ;;  %v2204_v8 = vshrl.u32 %v2193_v3, 16 }
 0x5f8   : > { %3096 = vmatmul.msk.bf16.vlgmr.msra.gmra.mxu3 %vm1680_vm4, %v2199_v2 }
 0x5f9   : > { %3097 = vmatmul.msk.bf16.vlgmr.msra.gmra.mxu0 %vm1680_vm4, %v2202_v4  ;;  %v2205_v12 = vpack.i.b16 %v2204_v8, %v2203_v7 }
 0x5fb   : > { %3098 = vmatmul.msk.bf16.vlgmr.msra.gmra.mxu1 %vm1680_vm4, %v2205_v12 }
 0x676   : > { %v2259_v14 = vpop.f32.mrf.mxu0 }
 0x678   : > { %v2278_v15 = vpop.f32.mrf.mxu1 }
 0x679   : > { %v2221_v16 = vpop.f32.mrf.mxu2 }
 0x67a   : > { %v3293_v18 = vpack.i.bf16 %v2221_v16, %v2259_v14 }
 0x67b   : > { %v2240_v11 = vpop.f32.mrf.mxu3 }
 0x67c   : > { %v3300_v19 = vpack.i.bf16 %v2240_v11, %v2278_v15  ;;  %3294 = vxpose.xlu0.b32.start.end [1/1] (short) (narrow) %v3293_v18, 8 }
 0x67e   : > { %3301 = vxpose.xlu2.b32.start.end [1/1] (short) (narrow) %v3300_v19, 8  ;;  %v2261_v9 = vpop.f32.mrf.mxu0 }
 0x680   : > { %v2280_v53 = vpop.f32.mrf.mxu1 }
 0x681   : > { %v2223_v20 = vpop.f32.mrf.mxu2 }
 0x683   : > { %v2242_v21 = vpop.f32.mrf.mxu3 }
 0x717   : > { %v3302_v29 = vpop.trf.xlu2 }
 0x718   : > { %v3306_v17 = vunpack.i.h.bf16 %v3302_v29  ;;  %v3303_v22 = vunpack.i.l.bf16 %v3302_v29 }
 0x71a   : > { %v2424_v23 = vrot.slane %v3306_v17, 4  ;;  %v2422_v25 = vrot.slane %v3303_v22, 4 }
 0x71c   : > { %v2423_v42 = vsel %vm1018_vm2, %v2422_v25, %v3306_v17  ;;  %v2425_v26 = vsel %vm1018_vm2, %v3303_v22, %v2424_v23 }
 0x71d   : > { %v2429_v27 = vperm.slane %v2423_v42, %v3739_v24  ;;  %v2433_v5 = vperm.slane %v2425_v26, %v3739_v24  ;;  %v3151_v42 = vld [vmem:[%s4209_s20 + $0x8] sm:$0xff] }
 0x71e   : > { %2567 = vmatpush.bf16.msra.mxu2 %v3151_v42 }
 0x71f   : > { %v2434_v32 = vrot.slane %v2429_v27, 4  ;;  %v2446_v13 = vrot.slane %v2433_v5, 4 }
 0x720   : > { %v3295_v46 = vpop.trf.xlu0 }
 0x721   : > { %v3299_v28 = vunpack.i.h.bf16 %v3295_v46  ;;  %v3296_v30 = vunpack.i.l.bf16 %v3295_v46 }
 0x723   : > { %v2412_v6 = vrot.slane %v3299_v28, 4  ;;  %v2410_v31 = vrot.slane %v3296_v30, 4 }
 0x725   : > { %v2411_v10 = vsel %vm1018_vm2, %v2410_v31, %v3299_v28  ;;  %v2413_v33 = vsel %vm1018_vm2, %v3296_v30, %v2412_v6  ;;  %v3310_v31 = vld [vmem:[%s4211_s6] ss:$0 sm:$0xff]  ;;  %s4223_s6 = sld [smem:[#allocation36_spill]] }
 0x726   : > { %v2417_v34 = vperm.slane %v2411_v10, %v3739_v24  ;;  %v2421_v36 = vperm.slane %v2413_v33, %v3739_v24  ;;  %v3339_v10 = vld [vmem:[%s3705_s16] sm:$0xff] }
 0x728   : > { %v2435_v37 = vsel %vm1018_vm2, %v2434_v32, %v2417_v34  ;;  %v2436_v38 = vrot.slane %v2417_v34, 4  ;;  %v2447_v39 = vsel %vm1018_vm2, %v2446_v13, %v2421_v36  ;;  %v2448_v40 = vrot.slane %v2421_v36, 4 }
 0x729   : > { %v2441_v41 = vperm.slane %v2435_v37, %v3748_v35  ;;  %v2453_v43 = vperm.slane %v2447_v39, %v3748_v35  ;;  %v3444_v37 = vmov 32.0  }
 0x72a   : > { %v2437_v44 = vsel %vm1018_vm2, %v2429_v27, %v2436_v38  ;;  %v2449_v45 = vsel %vm1018_vm2, %v2433_v5, %v2448_v40  ;;  %3333 = vrcp.f32 %v3444_v37 }
 0x72b   : > { %v2445_v47 = vperm.slane %v2437_v44, %v3748_v35  ;;  %v2457_v48 = vperm.slane %v2449_v45, %v3748_v35  ;;  %v2458_v49 = vrot.slane %v2441_v41, 4  ;;  %v2462_v51 = vrot.slane %v2453_v43, 4 }
 0x72d   : > { %v2460_v50 = vrot.slane %v2445_v47, 4  ;;  %v2464_v52 = vrot.slane %v2457_v48, 4  ;;  %v2459_v62 = vsel %vm1018_vm2, 0.0, %v2458_v49  ;;  %v2463_v63 = vsel %vm1018_vm2, 0.0, %v2462_v51  ;;  %v3153_v51 = vld [vmem:[%s4212_s8 + $0x8] sm:$0xff] }
 0x72e   : > { %2644 = vmatpush.bf16.msrb.mxu3 %v3153_v51 }
 0x72f   : > { %v2461_v54 = vsel %vm1018_vm2, 0.0, %v2460_v50  ;;  %v2465_v55 = vsel %vm1018_vm2, 0.0, %v2464_v52  ;;  %v2466_v56 = vsel %vm1018_vm2, %v2460_v50, %v2441_v41  ;;  %v2477_v57 = vsel %vm1018_vm2, %v2464_v52, %v2453_v43  ;;  %v3152_v52 = vld [vmem:[%s4212_s8] sm:$0xff] }
 0x730   : > { %v2470_v58 = vperm.slane %v2466_v56, %v3739_v24  ;;  %v2471_v59 = vrot.slane %v2461_v54, 4  ;;  %v2481_v60 = vperm.slane %v2477_v57, %v3739_v24  ;;  %v2482_v61 = vrot.slane %v2465_v55, 4  ;;  %v3334_v38 = vpop.eup %3333  ;;  %v3157_v54 = vld [vmem:[%s3688_s10 + $0x18] sm:$0xff]  ;;  %v3156_v57 = vld [vmem:[%s3688_s10 + $0x10] sm:$0xff] }
 0x731   : > { %v2579_v39 = vmul.f32 32.0, %v3334_v38  ;;  %vm2583_vm7 = vweird.f32 %v3334_v38  ;;  %2697 = vmatpush.bf16.msrb.mxu0 %v3157_v54 }
 0x732   : > { %v2472_v0 = vsel %vm1018_vm2, %v2471_v59, %v2459_v62  ;;  %v2483_v1 = vsel %vm1018_vm2, %v2482_v61, %v2463_v63  ;;  %v2490_v2 = vrot.slane %v2470_v58, 4  ;;  %v2502_v3 = vrot.slane %v2481_v60, 4  ;;  %2645 = vmatpush.bf16.msrb.mxu3 %v3152_v52  ;;  %v3155_v59 = vld [vmem:[%s3688_s10 + $0x8] sm:$0xff] }
 0x733   : > { %v2476_v4 = vperm.slane %v2472_v0, %v3739_v24  ;;  %v2487_v7 = vperm.slane %v2483_v1, %v3739_v24  ;;  %v2580_v40 = vsub.f32 1.0, %v2579_v39 }
 0x735   : > { %v2491_v8 = vsel %vm1018_vm2, %v2476_v4, %v2490_v2  ;;  %v2503_v12 = vsel %vm1018_vm2, %v2487_v7, %v2502_v3  ;;  %v2488_v14 = vrot.slane %v2476_v4, 4  ;;  %v2500_v15 = vrot.slane %v2487_v7, 4  ;;  %2698 = vmatpush.bf16.msrb.mxu0 %v3156_v57  ;;  %v3311_v2 = vld [vmem:[%s4214_s22] ss:$0 sm:$0xff] }
 0x736   : > { %v2499_v16 = vperm.slane %v2491_v8, %v3748_v35  ;;  %v2511_v18 = vperm.slane %v2503_v12, %v3748_v35  ;;  %v2581_v41 = vmul.f32 %v3334_v38, %v2580_v40  ;;  %v3312_v4 = vld [vmem:[%s4216_s21] ss:$0 sm:$0xff] }
 0x737   : > { %v2489_v11 = vsel %vm1018_vm2, %v2488_v14, %v2470_v58  ;;  %v2501_v19 = vsel %vm1018_vm2, %v2500_v15, %v2481_v60  ;;  %v3154_v15 = vld [vmem:[%s3688_s10] sm:$0xff]  ;;  %s4220_s10 = sld [smem:[#allocation9_spill]] }
 0x738   : > { %v2518_v9 = vrot.slane %v2499_v16, 4  ;;  %v2516_v53 = vrot.slane %v2511_v18, 4  ;;  %v2495_v20 = vperm.slane %v2489_v11, %v3748_v35  ;;  %v2507_v24 = vperm.slane %v2501_v19, %v3748_v35  ;;  %v3150_v35 = vld [vmem:[%s4209_s20] sm:$0xff] }
 0x739   : > { %2568 = vmatpush.bf16.msra.mxu2 %v3150_v35  ;;  %v2582_v43 = vadd.f32 %v3334_v38, %v2581_v41  ;;  %2699 = vmatpush.bf16.msrb.mxu0 %v3155_v59 }
 0x73a   : > { %v2519_v21 = vsel %vm1018_vm2, %v2511_v18, %v2518_v9  ;;  %v2517_v29 = vsel %vm1018_vm2, %v2516_v53, %v2499_v16  ;;  %v2512_v17 = vrot.slane %v2507_v24, 4  ;;  %v2514_v22 = vrot.slane %v2495_v20, 4  ;;  %v3313_v16 = vld [vmem:[%s4218_s26] ss:$0 sm:$0xff] }
 0x73b   : > { %2529 = vrot.lane.b32.xlu2 %v2519_v21, %s3441_s27  ;;  %2525 = vrot.lane.b32.xlu0 %v2517_v29, %s3442_s1  ;;  %v2584_v44 = vsel %vm2583_vm7, %v3334_v38, %v2582_v43  ;;  %s4221_s27 = sld [smem:[#allocation6_spill]] }
 0x73c   : > { %v2515_v23 = vsel %vm1018_vm2, %v2507_v24, %v2514_v22  ;;  %v2513_v25 = vsel %vm1018_vm2, %v2512_v17, %v2495_v20  ;;  %v3314_v20 = vld [vmem:[%s877_s9] ss:$0 sm:$0xff] }
 0x73d   : > { %2521 = vrot.lane.b32.xlu1 %v2515_v23, %s3443_s19  ;;  %2700 = vmatpush.bf16.msrb.mxu0 %v3154_v15  ;;  %s3135_s9 = sshll.u32 %s4220_s10, 3 }
 0x73e   : > { %s2760_s8 = scalar_lea.hbm %s4223_s6, %s3135_s9 }
 0x73f   : > { %s2764_s24 = sshll.u32 %s2760_s8, 4  ;;  %s2765_s24 = int_to_ptr.hbm [resolvable:$true] %s2764_s24 }
 0x740   : > { %s3354_s21 = sshra.s32 %s2765_s24, 4  ;;  %s3355_s21 = int_to_ptr.hbm [resolvable:$true] %s3354_s21 }
 0x741   : > { %s3356_s23 = scalar_lea.hbm %s3355_s21, 8  ;;  %p3361_p5 = scmp.lt.s32.totalorder %s3355_s21, %s4223_s6 }
 0x742   : > { %p3357_p1 = scmp.ne.s32.totalorder %s3355_s21, %s3356_s23 }
 0x744   : > { %p3358_p2 = pnand %p3357_p1, %p3594_p3 }
 0x746   : > { %p3359_p4 = pneg %p3358_p2 }
 0x795   : > { %v2530_v46 = vpop.permute.xlu2 %2529 }
 0x7ad   : > { %v2526_v27 = vpop.permute.xlu0 %2525 }
 0x7af   : > { %v2522_v26 = vpop.permute.xlu1 %2521 }
 0x7b0   : > { %v2532_v5 = vsel %vm1680_vm4, %v2513_v25, %v2522_v26 }
 0x7b1   : > { %v2534_v28 = vsel %vm2533_vm5, %v2532_v5, %v2526_v27 }
 0x7b2   : > { %v2536_v30 = vsel %vm2535_vm6, %v2534_v28, %v2530_v46 }
 0x7b3   : > { %v2537_v6 = vpack.c.bf16 %v2536_v30, %v2536_v30 }
 0x7b5   : > { %3107 = vmatmul.msk.bf16.vlgmr.msra.gmra.mxu2 %vm923_vm1, %v2537_v6 }
 0x838   : > { %v2570_v32 = vpop.f32.mrf.mxu2 }
 0x839   : > { %v2571_v13 = vadd.f32 %v3310_v31, %v2570_v32 }
 0x83b   : > { %v2574_v33 = vadd.f32 %v3339_v10, %v2571_v13  ;;  %v3315_v10 = vld [vmem:[%s880_s18] ss:$0 sm:$0xff]  ;;  %s4226_s18 = sand.u32 1, %s4221_s27  }
 0x83c   : > { %s2741_s28 = scalar_lea.sflag [#allocation3], %s4226_s18 }
 0x83d   : > { %v2575_v34 = vsel %vm923_vm1, %v2574_v33, 0.0 }
 0x83e   : > { %2576 = vadd.xlane.f32.xlu1 %v2575_v34 }
 0x840   : > { %v2572_v36 = vpop.f32.mrf.mxu2 }
 0x841   : > { %v3316_v36 = vld [vmem:[%s883_s11] ss:$0 sm:$0xff]  ;;  %s3360_s11 = scalar_lea.hbm %s4223_s6, 16 }
 0x842   : > { %p3362_p6 = scmp.lt.s32.totalorder %s3360_s11, %s3356_s23 }
 0x844   : > { %p3363_p7 = por %p3362_p6, %p3361_p5 }
 0x846   : > { %p3364_p8 = pnand %p3363_p7, %p3359_p4 }
 0x8b1   : > { %v2577_v45 = vpop.xlane.xlu1 %2576 }
 0x8b2   : > { %v2585_v47 = vmul.f32 %v2584_v44, %v2577_v45 }
 0x8b4   : > { %v2586_v48 = vsub.f32 %v2574_v33, %v2585_v47 }
 0x8b6   : > { %v2587_v49 = vmul.f32 %v2586_v48, %v2586_v48 }
 0x8b8   : > { %v2588_v50 = vsel %vm923_vm1, %v2587_v49, 0.0 }
 0x8b9   : > { %2589 = vadd.xlane.f32.xlu0 %v2588_v50 }
 0x92c   : > { %v2590_v55 = vpop.xlane.xlu0 %2589 }
 0x92d   : > { %v2591_v56 = vmul.f32 %v2590_v55, %v2584_v44 }
 0x92f   : > { %v2592_v58 = vadd.f32 1e-05, %v2591_v56 }
 0x931   : > { %3335 = vrsqrt.f32 %v2592_v58  ;;  %vm2599_vm9 = vweird.f32 %v2592_v58 }
 0x937   : > { %v3336_v60 = vpop.eup %3335 }
 0x938   : > { %v2594_v61 = vmul.f32 %v3336_v60, %v2592_v58  ;;  %vm2600_vm8 = vweird.f32 %v3336_v60 }
 0x939   : > { %vm2601_vm10 = vmor %vm2599_vm9, %vm2600_vm8 }
 0x93a   : > { %v2595_v62 = vmul.f32 %v3336_v60, %v2594_v61 }
 0x93c   : > { %v2596_v63 = vmul.f32 0.5, %v2595_v62 }
 0x93e   : > { %v2597_v0 = vsub.f32 1.5, %v2596_v63 }
 0x940   : > { %v2598_v1 = vmul.f32 %v3336_v60, %v2597_v0 }
 0x942   : > { %v2602_v3 = vsel %vm2601_vm10, %v3336_v60, %v2598_v1 }
 0x943   : > { %v2603_v7 = vmul.f32 %v2602_v3, %v2586_v48 }
 0x945   : > { %v2608_v8 = vmul.f32 %v3311_v2, %v2603_v7 }
 0x947   : > { %v2613_v12 = vadd.f32 %v3312_v4, %v2608_v8 }
 0x949   : > { %v2614_v14 = vpack.c.bf16 %v2613_v12, %v2613_v12 }
 0x94b   : > { %3116 = vmatmul.msk.bf16.vlgmr.msrb.gmra.mxu3 %vm923_vm1, %v2614_v14 }
 0x9ce   : > { %v2647_v18 = vpop.f32.mrf.mxu3 }
 0x9cf   : > { %v2648_v11 = vadd.f32 %v3313_v16, %v2647_v18 }
 0x9d1   : > { %v2651_v19 = vmax.f32 %v2648_v11, 0.0 }
 0x9d3   : > { %v2652_v9 = vpack.c.bf16 %v2651_v19, %v2651_v19 }
 0x9d5   : > { %3133 = vmatmul.msk.bf16.vlgmr.msrb.gmra.mxu0 %vm2689_vm11, %v2652_v9 }
 0x9d6   : > { %v2649_v53 = vpop.f32.mrf.mxu3 }
 0xa52   : > { %v2702_v24 = vpop.f32.mrf.mxu0 }
 0xa53   : > { %v2703_v21 = vadd.f32 %v3314_v20, %v2702_v24 }
 0xa55   : > { %v2706_v29 = vadd.f32 %v2703_v21, %v2613_v12 }
 0xa57   : > { %v2707_v17 = vsel %vm923_vm1, %v2706_v29, 0.0 }
 0xa58   : > { %2708 = vadd.xlane.f32.xlu2 %v2707_v17 }
 0xa5a   : > { %v2704_v22 = vpop.f32.mrf.mxu0 }
 0xacb   : > { %v2709_v23 = vpop.xlane.xlu2 %2708 }
 0xacc   : > { %v2710_v25 = vmul.f32 %v2709_v23, %v2584_v44 }
 0xace   : > { %v2711_v42 = vsub.f32 %v2706_v29, %v2710_v25 }
 0xad0   : > { %v2712_v35 = vmul.f32 %v2711_v42, %v2711_v42 }
 0xad2   : > { %v2713_v26 = vsel %vm923_vm1, %v2712_v35, 0.0 }
 0xad3   : > { %2714 = vadd.xlane.f32.xlu1 %v2713_v26 }
 0xb46   : > { %v2715_v27 = vpop.xlane.xlu1 %2714 }
 0xb47   : > { %v2716_v5 = vmul.f32 %v2715_v27, %v2584_v44 }
 0xb49   : > { %v2717_v46 = vadd.f32 1e-05, %v2716_v5 }
 0xb4b   : > { %3337 = vrsqrt.f32 %v2717_v46  ;;  %vm2724_vm13 = vweird.f32 %v2717_v46 }
 0xb51   : > { %v3338_v28 = vpop.eup %3337 }
 0xb52   : > { %v2719_v30 = vmul.f32 %v3338_v28, %v2717_v46  ;;  %vm2725_vm12 = vweird.f32 %v3338_v28 }
 0xb53   : > { %vm2726_vm14 = vmor %vm2724_vm13, %vm2725_vm12 }
 0xb54   : > { %v2720_v6 = vmul.f32 %v3338_v28, %v2719_v30 }
 0xb56   : > { %v2721_v31 = vmul.f32 0.5, %v2720_v6 }
 0xb58   : > { %v2722_v32 = vsub.f32 1.5, %v2721_v31 }
 0xb5a   : > { %v2723_v13 = vmul.f32 %v3338_v28, %v2722_v32 }
 0xb5c   : > { %v2727_v33 = vsel %vm2726_vm14, %v3338_v28, %v2723_v13 }
 0xb5d   : > { %v2728_v34 = vmul.f32 %v2727_v33, %v2711_v42 }
 0xb5f   : > { %v2733_v37 = vmul.f32 %v3315_v10, %v2728_v34 }
 0xb61   : > { %v2738_v38 = vadd.f32 %v3316_v36, %v2733_v37 }
 0xb63   : > { %2739 = vst.msk [vmem:[%s3705_s16] sm:$0xff] %vm923_vm1, %v2738_v38 }
 0xb64   : > { %3367 = shalt.err (!%p3364_p8)
}
 0xb65   : > { %3158 = dma.vmem_to_hbm [thread:$0]  (%p3594_p3), %s2763_s25, 128, %s2765_s24, %s2741_s28  }
 0xb66 PF: > { %s4227_s16 = sld [smem:[#allocation12_spill]] }
 0xb67   : > { %s4228_s4 = sld [smem:[#allocation5_spill]] }
 0xb6c   : > { %p3164_p10 = scmp.ge.s32.totalorder %s4227_s16, 2 }
 0xb6d   : > { %s2779_s20 = sand.u32 1, %s4228_s4  }
 0xb6e   : > { %p3161_p11 = pnand %p3164_p10, %p3604_p9  ;;  %s2780_s10 = scalar_lea.sflag [#allocation3], %s2779_s20 }
 0xb70   : > { %p3162_p12 = pneg %p3161_p11 }
 0xb72   : > { %3401 = dma.done.wait (%p3162_p12), %s2780_s10, 128  }
 0xb73   : > { %3403 = vsyncadd (%p3162_p12), %s2780_s10, 4294967168  ;;  %s33_s23 = sadd.s32 1, %s4227_s16   ;;  %s4230_s0 = sld [smem:[#allocation6_spill]] }
 0xb74   : > { %p30_p13 = scmp.ge.s32.totalorder %s33_s23, 6   ;;  %s4231_s30 = sld [smem:[#allocation7_spill]] }
 0xb75   : > { %s4232_s20 = sld [smem:[#allocation17_spill]] }
 0xb76   : > { %s4233_s21 = sld [smem:[#allocation10_spill]]  ;;  %32 = sbr.rel (!%p30_p13) target bundleno = 24 (0x18), region = 191 }
 0xb77   : > { %s4234_s1 = sld [smem:[#allocation11_spill]] }
 0xb78   : > { %s4235_s22 = sld [smem:[#allocation13_spill]] }
 0xb79   : > { %s4236_s2 = sld [smem:[#allocation15_spill]] }
 0xb7b   :  { %2798 = vsyncpa [#allocation3], 1 }
 0xb7c   :  { %2800 = vsyncpa [#allocation3 + $0x1], 1 }

</bundles_post_ra>
